<compile_context>
chip_gen: v7x
topology: tpu7x:2x2x1
jax: 0.10.0
libtpu: 0.0.40
codegen_flags: <defaults>
</compile_context>

<pallas_src>
import functools

import jax
import jax.numpy as jnp
from jax.experimental import pallas as pl
from jax.experimental.pallas import tpu as pltpu

NUM_LAYERS = 4


def _round_up(n, m):
    return ((n + m - 1) // m) * m


def _block_diag(blocks):
    """Block-diagonal stack of equally shaped 2-D blocks (plain JAX glue)."""
    nr, nc = blocks[0].shape
    out = jnp.zeros((len(blocks) * nr, len(blocks) * nc), blocks[0].dtype)
    for l, blk in enumerate(blocks):
        out = out.at[l * nr:(l + 1) * nr, l * nc:(l + 1) * nc].set(blk)
    return out


def _nice_fwd_kernel(x_ref, w1_ref, b1_ref, w2_ref, b2_ref, w3_ref, b3_ref,
                     z_ref, ld_ref, *, half, mm_dtype):
    # x_ref / z_ref : [TB, D] f32 (natural layout); ld_ref : [1, TB] f32
    # w1_ref: [L*H, half]   b1_ref: [L*H, 1]
    # w2_ref: [L*H, L*H]    b2_ref: [L*H, 1]     (block-diagonal per layer)
    # w3_ref: [L*D, L*H]    b3_ref: [L*D, 1]     (block-diagonal per layer)
    D = 2 * half
    x = x_ref[...]                                # [TB, D] f32
    xT = jnp.transpose(x, (1, 0))                 # [D, TB]: batch on the lane axis
    x1 = xT[:half, :]                             # fixed across layers (no permute in fwd)
    x2 = xT[half:, :]

    # ---- fused MLPs of ALL coupling layers (they only depend on x1) ----
    h1 = jnp.maximum(
        jnp.dot(w1_ref[...], x1.astype(mm_dtype),
                preferred_element_type=jnp.float32) + b1_ref[...],
        0.0).astype(mm_dtype)                     # [L*H, TB], single bf16 copy
    h2 = jnp.maximum(
        jnp.dot(w2_ref[...], h1,
                preferred_element_type=jnp.float32) + b2_ref[...],
        0.0).astype(mm_dtype)                     # [L*H, TB]
    st = jnp.dot(w3_ref[...], h2,
                 preferred_element_type=jnp.float32) + b3_ref[...]   # [L*D, TB] f32

    # ---- serial coupling chain (cheap lane-dense VPU/EUP work, all f32) ----
    s_acc = jnp.zeros_like(x2)
    for l in range(NUM_LAYERS):                   # static unroll: short fixed trip count
        s = jnp.tanh(st[l * D: l * D + half, :])
        t = st[l * D + half: (l + 1) * D, :]
        x2 = x2 * jnp.exp(s) + t
        s_acc = s_acc + s

    # z = [x1 | x2']: x1 half copied straight from the untransposed input block,
    # only the updated x2 half is transposed back. Single XLU reduce for log-det.
    z_ref[:, :half] = x[:, :half]
    z_ref[:, half:] = jnp.transpose(x2, (1, 0))
    ld_ref[...] = jnp.sum(s_acc, axis=0, keepdims=True)


def nice_forward(x, params, *, block_b=4096, mm_dtype=jnp.bfloat16):
    """Fused NICE forward. x: [B, D] f32. Returns (z [B, D], log_det [B])."""
    w1, b1, w2, b2, w3, b3 = params
    B, D = x.shape
    L, half, H = w1.shape
    assert L == NUM_LAYERS and D == 2 * half
    assert half % 8 == 0, "half must be a multiple of 8 (sublane-aligned splits)"

    # ---- parameter prep (plain JAX glue; layers fused / block-diagonalized) ----
    W1T = jnp.transpose(w1, (0, 2, 1)).reshape(L * H, half).astype(mm_dtype)
    b1T = b1.reshape(L * H, 1).astype(jnp.float32)
    W2T = _block_diag([w2[l].T for l in range(L)]).astype(mm_dtype)     # [L*H, L*H]
    b2T = b2.reshape(L * H, 1).astype(jnp.float32)
    W3T = _block_diag([w3[l].T for l in range(L)]).astype(mm_dtype)     # [L*D, L*H]
    b3T = b3.reshape(L * D, 1).astype(jnp.float32)

    # ---- batch tiling: >=2 grid steps when possible, big tiles, no host padding ----
    TB = _round_up(max(1, (B + 1) // 2), 128)          # target two grid steps
    TB = max(128, min(TB, _round_up(block_b, 128)))    # cap by requested block size
    grid = (pl.cdiv(B, TB),)                           # tail block is masked by Pallas

    # VMEM limit sized per chip generation (v7x: 64 MiB physical -> 32 MiB;
    # v6e/v5e: 128 MiB -> 64 MiB).  Fallback is safe everywhere.
    try:
        phys_vmem = pltpu.get_tpu_info().vmem_capacity_bytes
    except Exception:
        phys_vmem = 64 * 1024 * 1024
    vmem_limit = min(phys_vmem // 2, 96 * 1024 * 1024)

    resident = lambda arr: pl.BlockSpec(arr.shape, lambda i: (0, 0))    # stays in VMEM

    z, ld = pl.pallas_call(
        functools.partial(_nice_fwd_kernel, half=half, mm_dtype=mm_dtype),
        out_shape=(jax.ShapeDtypeStruct((B, D), jnp.float32),
                   jax.ShapeDtypeStruct((1, B), jnp.float32)),
        grid=grid,
        in_specs=[pl.BlockSpec((TB, D), lambda i: (i, 0)),
                  resident(W1T), resident(b1T),
                  resident(W2T), resident(b2T),
                  resident(W3T), resident(b3T)],
        out_specs=(pl.BlockSpec((TB, D), lambda i: (i, 0)),
                   pl.BlockSpec((1, TB), lambda i: (0, i))),
        compiler_params=pltpu.CompilerParams(
            dimension_semantics=("parallel",),      # shard batch tiles across TCs (v7x)
            vmem_limit_bytes=vmem_limit),
    )(x.astype(jnp.float32), W1T, b1T, W2T, b2T, W3T, b3T)

    return z, ld[0]


def nice_ref(x, params, mm_dtype=jnp.float32):
    """Pure-JAX per-layer reference (PyTorch semantics); optional bf16 matmul cast."""
    w1, b1, w2, b2, w3, b3 = params
    half = x.shape[1] // 2
    x1, x2 = x[:, :half], x[:, half:]
    ld = jnp.zeros((x.shape[0],), jnp.float32)
    for l in range(NUM_LAYERS):
        h = jax.nn.relu(jnp.dot(x1.astype(mm_dtype), w1[l].astype(mm_dtype),
                                preferred_element_type=jnp.float32) + b1[l])
        h = jax.nn.relu(jnp.dot(h.astype(mm_dtype), w2[l].astype(mm_dtype),
                                preferred_element_type=jnp.float32) + b2[l])
        st = jnp.dot(h.astype(mm_dtype), w3[l].astype(mm_dtype),
                     preferred_element_type=jnp.float32) + b3[l]
        s = jnp.tanh(st[:, :half])
        t = st[:, half:]
        x2 = x2 * jnp.exp(s) + t
        ld = ld + s.sum(axis=1)
    return jnp.concatenate([x1, x2], axis=1), ld


def make_params(key, dim, hidden_dim=64, num_layers=NUM_LAYERS):
    half = dim // 2
    w1s, b1s, w2s, b2s, w3s, b3s = [], [], [], [], [], []
    for l in range(num_layers):
        k = jax.random.fold_in(key, l)
        k1, k2, k3, k4, k5, k6 = jax.random.split(k, 6)
        lim1 = 1.0 / jnp.sqrt(half)
        lim2 = 1.0 / jnp.sqrt(hidden_dim)
        w1s.append(jax.random.uniform(k1, (half, hidden_dim), jnp.float32, -lim1, lim1))
        b1s.append(jax.random.uniform(k2, (1, hidden_dim), jnp.float32, -lim1, lim1))
        w2s.append(jax.random.uniform(k3, (hidden_dim, hidden_dim), jnp.float32, -lim2, lim2))
        b2s.append(jax.random.uniform(k4, (1, hidden_dim), jnp.float32, -lim2, lim2))
        # Last Linear: PyTorch zero-fills it; use small deterministic values instead.
        w3s.append(0.01 * jax.random.normal(k5, (hidden_dim, 2 * half), jnp.float32))
        b3s.append(0.01 * jax.random.normal(k6, (1, 2 * half), jnp.float32))
    return tuple(jnp.stack(a) for a in (w1s, b1s, w2s, b2s, w3s, b3s))


if __name__ == "__main__":
    B, DIM, HIDDEN = 500, 16, 64          # non-multiple B exercises the masked tail block
    key = jax.random.PRNGKey(0)
    kx, kp = jax.random.split(key)
    x = jax.random.normal(kx, (B, DIM), jnp.float32)
    params = make_params(kp, DIM, HIDDEN)

    z, log_det = nice_forward(x, params, mm_dtype=jnp.bfloat16)
    jax.block_until_ready((z, log_det))

    # Check 1: tight check vs a reference using the same bf16-matmul / f32-accumulate recipe.
    z_bf, ld_bf = nice_ref(x, params, mm_dtype=jnp.bfloat16)
    assert jnp.allclose(z, z_bf, atol=2e-3, rtol=2e-3), "z mismatch vs bf16 reference"
    assert jnp.allclose(log_det, ld_bf, atol=2e-3, rtol=2e-3), "log_det mismatch vs bf16 reference"

    # Check 2: sanity vs the full-f32 reference (looser: bf16 matmul rounding).
    z_f32, ld_f32 = nice_ref(x, params, mm_dtype=jnp.float32)
    assert jnp.allclose(z, z_f32, atol=5e-2, rtol=5e-2), "z mismatch vs f32 reference"
    assert jnp.allclose(log_det, ld_f32, atol=5e-2, rtol=5e-2), "log_det mismatch vs f32 reference"

    print("KERNEL_OK")
</pallas_src>

<mosaic_0001>
module attributes {stable_mosaic.version = 11 : i64} {
  func.func @_nice_fwd_kernel(%arg0: i32, %arg1: memref<256x16xf32, #tpu.memory_space<vmem>>, %arg2: memref<256x8xbf16, #tpu.memory_space<vmem>>, %arg3: memref<256x1xf32, #tpu.memory_space<vmem>>, %arg4: memref<256x256xbf16, #tpu.memory_space<vmem>>, %arg5: memref<256x1xf32, #tpu.memory_space<vmem>>, %arg6: memref<64x256xbf16, #tpu.memory_space<vmem>>, %arg7: memref<64x1xf32, #tpu.memory_space<vmem>>, %arg8: memref<256x16xf32, #tpu.memory_space<vmem>>, %arg9: memref<1x256xf32, #tpu.memory_space<vmem>>) attributes {dimension_semantics = [#tpu.dimension_semantics<parallel>], iteration_bounds = array<i64: 2>, scalar_prefetch = 0 : i64, scratch_operands = 0 : i64, tpu.core_type = #tpu.core_type<tc>, window_params = [{transform_indices = @transform_0, window_bounds = array<i64: 256, 16>}, {pipeline_mode = #tpu.pipeline_mode<synchronous>, transform_indices = @transform_1, window_bounds = array<i64: 256, 8>}, {pipeline_mode = #tpu.pipeline_mode<synchronous>, transform_indices = @transform_2, window_bounds = array<i64: 256, 1>}, {pipeline_mode = #tpu.pipeline_mode<synchronous>, transform_indices = @transform_3, window_bounds = array<i64: 256, 256>}, {pipeline_mode = #tpu.pipeline_mode<synchronous>, transform_indices = @transform_4, window_bounds = array<i64: 256, 1>}, {pipeline_mode = #tpu.pipeline_mode<synchronous>, transform_indices = @transform_5, window_bounds = array<i64: 64, 256>}, {pipeline_mode = #tpu.pipeline_mode<synchronous>, transform_indices = @transform_6, window_bounds = array<i64: 64, 1>}, {transform_indices = @transform_7, window_bounds = array<i64: 256, 16>}, {transform_indices = @transform_8, window_bounds = array<i64: 1, 256>}]} {
    %c0 = arith.constant 0 : index
    %c0_0 = arith.constant 0 : index
    %0 = vector.load %arg1[%c0, %c0_0] : memref<256x16xf32, #tpu.memory_space<vmem>>, vector<256x16xf32>
    %1 = tpu.transpose %0, [1, 0] : vector<256x16xf32> -> vector<16x256xf32>
    %2 = vector.extract_strided_slice %1 {offsets = [0, 0], sizes = [8, 256], strides = [1, 1]} : vector<16x256xf32> to vector<8x256xf32>
    %3 = vector.extract_strided_slice %1 {offsets = [8, 0], sizes = [8, 256], strides = [1, 1]} : vector<16x256xf32> to vector<8x256xf32>
    %c0_1 = arith.constant 0 : index
    %c0_2 = arith.constant 0 : index
    %4 = vector.load %arg2[%c0_1, %c0_2] : memref<256x8xbf16, #tpu.memory_space<vmem>>, vector<256x8xbf16>
    %5 = arith.truncf %2 : vector<8x256xf32> to vector<8x256xbf16>
    %cst = arith.constant dense<0.000000e+00> : vector<256x256xf32>
    %6 = tpu.matmul %4, %5, %cst {dimension_numbers = #tpu.dot_dimension_numbers<[1], [0], [0], [1], [0, 0, 1, 1], [], []>} : vector<256x8xbf16>, vector<8x256xbf16>, vector<256x256xf32> -> vector<256x256xf32>
    %c0_3 = arith.constant 0 : index
    %c0_4 = arith.constant 0 : index
    %7 = vector.load %arg3[%c0_3, %c0_4] : memref<256x1xf32, #tpu.memory_space<vmem>>, vector<256x1xf32>
    %8 = vector.broadcast %7 : vector<256x1xf32> to vector<256x256xf32>
    %9 = arith.addf %6, %8 : vector<256x256xf32>
    %cst_5 = arith.constant 0.000000e+00 : f32
    %10 = vector.broadcast %cst_5 : f32 to vector<256x256xf32>
    %11 = arith.maximumf %9, %10 : vector<256x256xf32>
    %12 = arith.truncf %11 : vector<256x256xf32> to vector<256x256xbf16>
    %c0_6 = arith.constant 0 : index
    %c0_7 = arith.constant 0 : index
    %13 = vector.load %arg4[%c0_6, %c0_7] : memref<256x256xbf16, #tpu.memory_space<vmem>>, vector<256x256xbf16>
    %cst_8 = arith.constant dense<0.000000e+00> : vector<256x256xf32>
    %14 = tpu.matmul %13, %12, %cst_8 {dimension_numbers = #tpu.dot_dimension_numbers<[1], [0], [0], [1], [0, 0, 1, 1], [], []>} : vector<256x256xbf16>, vector<256x256xbf16>, vector<256x256xf32> -> vector<256x256xf32>
    %c0_9 = arith.constant 0 : index
    %c0_10 = arith.constant 0 : index
    %15 = vector.load %arg5[%c0_9, %c0_10] : memref<256x1xf32, #tpu.memory_space<vmem>>, vector<256x1xf32>
    %16 = vector.broadcast %15 : vector<256x1xf32> to vector<256x256xf32>
    %17 = arith.addf %14, %16 : vector<256x256xf32>
    %cst_11 = arith.constant 0.000000e+00 : f32
    %18 = vector.broadcast %cst_11 : f32 to vector<256x256xf32>
    %19 = arith.maximumf %17, %18 : vector<256x256xf32>
    %20 = arith.truncf %19 : vector<256x256xf32> to vector<256x256xbf16>
    %c0_12 = arith.constant 0 : index
    %c0_13 = arith.constant 0 : index
    %21 = vector.load %arg6[%c0_12, %c0_13] : memref<64x256xbf16, #tpu.memory_space<vmem>>, vector<64x256xbf16>
    %cst_14 = arith.constant dense<0.000000e+00> : vector<64x256xf32>
    %22 = tpu.matmul %21, %20, %cst_14 {dimension_numbers = #tpu.dot_dimension_numbers<[1], [0], [0], [1], [0, 0, 1, 1], [], []>} : vector<64x256xbf16>, vector<256x256xbf16>, vector<64x256xf32> -> vector<64x256xf32>
    %c0_15 = arith.constant 0 : index
    %c0_16 = arith.constant 0 : index
    %23 = vector.load %arg7[%c0_15, %c0_16] : memref<64x1xf32, #tpu.memory_space<vmem>>, vector<64x1xf32>
    %24 = vector.broadcast %23 : vector<64x1xf32> to vector<64x256xf32>
    %25 = arith.addf %22, %24 : vector<64x256xf32>
    %cst_17 = arith.constant 0.000000e+00 : f32
    %26 = vector.broadcast %cst_17 : f32 to vector<8x256xf32>
    %27 = vector.extract_strided_slice %25 {offsets = [0, 0], sizes = [8, 256], strides = [1, 1]} : vector<64x256xf32> to vector<8x256xf32>
    %28 = math.tanh %27 : vector<8x256xf32>
    %29 = vector.extract_strided_slice %25 {offsets = [8, 0], sizes = [8, 256], strides = [1, 1]} : vector<64x256xf32> to vector<8x256xf32>
    %30 = math.exp %28 : vector<8x256xf32>
    %31 = arith.mulf %3, %30 : vector<8x256xf32>
    %32 = arith.addf %31, %29 : vector<8x256xf32>
    %33 = arith.addf %26, %28 : vector<8x256xf32>
    %34 = vector.extract_strided_slice %25 {offsets = [16, 0], sizes = [8, 256], strides = [1, 1]} : vector<64x256xf32> to vector<8x256xf32>
    %35 = math.tanh %34 : vector<8x256xf32>
    %36 = vector.extract_strided_slice %25 {offsets = [24, 0], sizes = [8, 256], strides = [1, 1]} : vector<64x256xf32> to vector<8x256xf32>
    %37 = math.exp %35 : vector<8x256xf32>
    %38 = arith.mulf %32, %37 : vector<8x256xf32>
    %39 = arith.addf %38, %36 : vector<8x256xf32>
    %40 = arith.addf %33, %35 : vector<8x256xf32>
    %41 = vector.extract_strided_slice %25 {offsets = [32, 0], sizes = [8, 256], strides = [1, 1]} : vector<64x256xf32> to vector<8x256xf32>
    %42 = math.tanh %41 : vector<8x256xf32>
    %43 = vector.extract_strided_slice %25 {offsets = [40, 0], sizes = [8, 256], strides = [1, 1]} : vector<64x256xf32> to vector<8x256xf32>
    %44 = math.exp %42 : vector<8x256xf32>
    %45 = arith.mulf %39, %44 : vector<8x256xf32>
    %46 = arith.addf %45, %43 : vector<8x256xf32>
    %47 = arith.addf %40, %42 : vector<8x256xf32>
    %48 = vector.extract_strided_slice %25 {offsets = [48, 0], sizes = [8, 256], strides = [1, 1]} : vector<64x256xf32> to vector<8x256xf32>
    %49 = math.tanh %48 : vector<8x256xf32>
    %50 = vector.extract_strided_slice %25 {offsets = [56, 0], sizes = [8, 256], strides = [1, 1]} : vector<64x256xf32> to vector<8x256xf32>
    %51 = math.exp %49 : vector<8x256xf32>
    %52 = arith.mulf %46, %51 : vector<8x256xf32>
    %53 = arith.addf %52, %50 : vector<8x256xf32>
    %54 = arith.addf %47, %49 : vector<8x256xf32>
    %55 = vector.extract_strided_slice %0 {offsets = [0, 0], sizes = [256, 8], strides = [1, 1]} : vector<256x16xf32> to vector<256x8xf32>
    %c0_18 = arith.constant 0 : index
    %c0_19 = arith.constant 0 : index
    %56 = vector.load %arg8[%c0_18, %c0_19] : memref<256x16xf32, #tpu.memory_space<vmem>>, vector<256x8xf32>
    tpu.vector_store %arg8[%c0_18, %c0_19], %55 {strides = array<i32>} : memref<256x16xf32, #tpu.memory_space<vmem>>, vector<256x8xf32>,
    %57 = tpu.transpose %53, [1, 0] : vector<8x256xf32> -> vector<256x8xf32>
    %c0_20 = arith.constant 0 : index
    %c8 = arith.constant 8 : index
    %58 = vector.load %arg8[%c0_20, %c8] : memref<256x16xf32, #tpu.memory_space<vmem>>, vector<256x8xf32>
    tpu.vector_store %arg8[%c0_20, %c8], %57 {strides = array<i32>} : memref<256x16xf32, #tpu.memory_space<vmem>>, vector<256x8xf32>,
    %cst_21 = arith.constant dense<0.000000e+00> : vector<256xf32>
    %59 = vector.multi_reduction <add>, %54, %cst_21 [0] : vector<8x256xf32> to vector<256xf32>
    %60 = vector.shape_cast %59 : vector<256xf32> to vector<1x256xf32>
    %c0_22 = arith.constant 0 : index
    %c0_23 = arith.constant 0 : index
    %61 = vector.load %arg9[%c0_22, %c0_23] : memref<1x256xf32, #tpu.memory_space<vmem>>, vector<1x256xf32>
    tpu.vector_store %arg9[%c0_22, %c0_23], %60 {strides = array<i32>} : memref<1x256xf32, #tpu.memory_space<vmem>>, vector<1x256xf32>,
    return
  }
  func.func @transform_0(%arg0: i32) -> (i32, i32) {
    %c0_i32 = arith.constant 0 : i32
    %c0_i32_0 = arith.constant 0 : i32
    return %arg0, %c0_i32 : i32, i32
  }
  func.func @transform_1(%arg0: i32) -> (i32, i32) {
    %c0_i32 = arith.constant 0 : i32
    %c0_i32_0 = arith.constant 0 : i32
    %c0_i32_1 = arith.constant 0 : i32
    return %c0_i32, %c0_i32_0 : i32, i32
  }
  func.func @transform_2(%arg0: i32) -> (i32, i32) {
    %c0_i32 = arith.constant 0 : i32
    %c0_i32_0 = arith.constant 0 : i32
    %c0_i32_1 = arith.constant 0 : i32
    return %c0_i32, %c0_i32_0 : i32, i32
  }
  func.func @transform_3(%arg0: i32) -> (i32, i32) {
    %c0_i32 = arith.constant 0 : i32
    %c0_i32_0 = arith.constant 0 : i32
    %c0_i32_1 = arith.constant 0 : i32
    return %c0_i32, %c0_i32_0 : i32, i32
  }
  func.func @transform_4(%arg0: i32) -> (i32, i32) {
    %c0_i32 = arith.constant 0 : i32
    %c0_i32_0 = arith.constant 0 : i32
    %c0_i32_1 = arith.constant 0 : i32
    return %c0_i32, %c0_i32_0 : i32, i32
  }
  func.func @transform_5(%arg0: i32) -> (i32, i32) {
    %c0_i32 = arith.constant 0 : i32
    %c0_i32_0 = arith.constant 0 : i32
    %c0_i32_1 = arith.constant 0 : i32
    return %c0_i32, %c0_i32_0 : i32, i32
  }
  func.func @transform_6(%arg0: i32) -> (i32, i32) {
    %c0_i32 = arith.constant 0 : i32
    %c0_i32_0 = arith.constant 0 : i32
    %c0_i32_1 = arith.constant 0 : i32
    return %c0_i32, %c0_i32_0 : i32, i32
  }
  func.func @transform_7(%arg0: i32) -> (i32, i32) {
    %c0_i32 = arith.constant 0 : i32
    %c0_i32_0 = arith.constant 0 : i32
    return %arg0, %c0_i32 : i32, i32
  }
  func.func @transform_8(%arg0: i32) -> (i32, i32) {
    %c0_i32 = arith.constant 0 : i32
    %c0_i32_0 = arith.constant 0 : i32
    return %c0_i32, %arg0 : i32, i32
  }
}

</mosaic_0001>

<bundles_post_ra>
// kernel: tpu_custom_call.1
= control target key start
LH: loop header
LB: loop body
LE: loop exit
PB: predicated region body
PF: predicated region fallthrough
CT: control target
= control target key end

     0   :  { %s4027_s0 = inlined_call_operand.vmem [shape: f32[500,16], index: 0, kind: input, shape index: {}]   ;;  %s4028_s1 = inlined_call_operand.vmem [shape: bf16[256,8], index: 1, kind: input, shape index: {}]   ;;  %s4029_s2 = inlined_call_operand.vmem [shape: f32[256,1], index: 2, kind: input, shape index: {}]   ;;  %s4030_s3 = inlined_call_operand.vmem [shape: bf16[256,256], index: 3, kind: input, shape index: {}]   ;;  %s4031_s4 = inlined_call_operand.vmem [shape: f32[256,1], index: 4, kind: input, shape index: {}]   ;;  %s4032_s5 = inlined_call_operand.vmem [shape: bf16[64,256], index: 5, kind: input, shape index: {}]   ;;  %s4033_s6 = inlined_call_operand.vmem [shape: f32[64,1], index: 6, kind: input, shape index: {}]   ;;  %s4034_s7 = inlined_call_operand.vmem [shape: f32[500,16], index: 7, kind: output, shape index: {0}]   ;;  %s4035_s8 = inlined_call_operand.hbm [shape: f32[1,500], index: 8, kind: output, shape index: {1}]  }
   0x1   :  { %4036 = sst [smem:[#allocation6_spill]] %s4027_s0 }
   0x2   :  { %4037 = sst [smem:[#allocation7_spill]] %s4028_s1 }
   0x3   :  { %4038 = sst [smem:[#allocation8_spill]] %s4029_s2 }
   0x4   :  { %4039 = sst [smem:[#allocation9_spill]] %s4030_s3 }
   0x5   :  { %4040 = sst [smem:[#allocation10_spill]] %s4031_s4 }
   0x6   :  { %14 = vsyncpa [#allocation4], 0 }
   0x7   :  { %16 = vsyncpa [#allocation4 + $0x1], 0  ;;  %s3158_s27 = smov 0   ;;  %s3160_s28 = smov 0  }
   0x8   :  { %s3162_s29 = smov 0   ;;  %s3164_s30 = smov 0  }
   0x9 LB: > { %s3179_s9 = sadd.s32 4294967295, %s3075_s30   ;;  %s2659_s10 = sadd.s32 4294967294, %s3075_s30   ;;  %s3075_s30 = sphi %s3164_s30, %s4057_s30   ;;  %s3071_s29 = sphi %s3162_s29, %s4056_s29   ;;  %s3067_s28 = sphi %s3160_s28, %s4055_s28   ;;  %s3063_s27 = sphi %s3158_s27, %s4054_s27  }
   0xa   : > { %s3183_s11 = sadd.s32 1, %s3075_s30   ;;  %s181_s12 = sadd.s32 1, %s3071_s29 }
   0xb   : > { %s178_s13 = ssub.s32 %s3075_s30, %s3183_s11  ;;  %p191_p0 = scmp.ne.s32.totalorder %s3071_s29, %s3067_s28 }
   0xc   : > { %p179_p1 = scmp.eq.s32.totalorder %s178_s13, 0  ;;  %p192_p2 = scmp.eq.s32.totalorder %s3179_s9, 1 }
   0xd   : > { %p223_p3 = scmp.ne.s32.totalorder %s3067_s28, %s3063_s27  ;;  %p224_p4 = scmp.eq.s32.totalorder %s2659_s10, 1 }
   0xe   : > { %s3194_s14 = scalar_select %p179_p1, %s3071_s29, %s181_s12  }
   0xf   : > { %p3196_p5 = por %p192_p2, %p191_p0  ;;  %p3200_p6 = por %p224_p4, %p223_p3 }
  0x10   : > { %p2662_p7 = scmp.ge.s32.totalorder %s3075_s30, 1  ;;  %p277_p8 = scmp.lt.s32.totalorder %s3075_s30, 3 }
  0x12   : > { %p278_p9 = pnand %p2662_p7, %p277_p8 }
  0x13   : > { %s3207_s17 = sshll.u32 (!%p278_p9), %s3179_s9, 5  ;;  %s3210_s18 = sand.u32 (!%p278_p9), 1, %s3067_s28   ;;  %vm742_vm0 = vcmask (!%p278_p9), 64512   ;;  %v3109_v21 = vmov (!%p278_p9), 0   ;;  %vm791_vm1 = vcmask (!%p278_p9), 1043456   ;;  %vm2201_vm3 = vcmask (!%p278_p9), 130112  }
  0x14   : > { %281 = sbr.rel (%p278_p9) target bundleno = 1513 (0x5e9), region = 48  ;;  %p324_p10 = scmp.lt.s32.totalorder (!%p278_p9), %s3207_s17, 62  ;;  %830 = vmatprep.mubr.bf16.mxu0 (!%p278_p9), %v3109_v21 }
  0x15   : > { %s2663_s19 = sshll.u32 (!%p278_p9), %s3210_s18, 8  ;;  %s4043_s0 = sld [smem:[#allocation6_spill]] (!%p278_p9) }
  0x16   : > { %s3223_s25 = scalar_lea.vmem (!%p278_p9), [#allocation2], %s2663_s19   ;;  %s4044_s2 = sld [smem:[#allocation8_spill]] (!%p278_p9) }
  0x17   : > { %s4045_s1 = sld [smem:[#allocation7_spill]] (!%p278_p9)  ;;  %s4046_s4 = sld [smem:[#allocation10_spill]] (!%p278_p9) }
  0x18   : > { %s4047_s3 = sld [smem:[#allocation9_spill]] (!%p278_p9)  ;;  %s3111_s23 = smov (!%p278_p9), 8  }
  0x1b   : > { %s325_s20 = scalar_select %p324_p10, %s3207_s17, 62 }
  0x1c   : > { %v471_v33 = vld [vmem:[%s4044_s2 + $0x8] sm:$0xff]  ;;  %v472_v34 = vld [vmem:[%s4044_s2 + $0x10] sm:$0xff]  ;;  %v473_v35 = vld [vmem:[%s4044_s2 + $0x18] sm:$0xff]  ;;  %s2282_s26 = ssub.s32 (%p3196_p5), 63, %s3207_s17  ;;  %s2760_s10 = sshll.u32 (%p3196_p5), %s3179_s9, 8 }
  0x1d   : > { %s2666_s21 = sshll.u32 %s325_s20, 3  ;;  %v470_v36 = vld [vmem:[%s4044_s2] sm:$0xff]  ;;  %v475_v38 = vld [vmem:[%s4044_s2 + $0x28] sm:$0xff]  ;;  %v476_v39 = vld [vmem:[%s4044_s2 + $0x30] sm:$0xff]  ;;  %p2283_p11 = scmp.lt.s32.totalorder (%p3196_p5), %s2282_s26, 32 }
  0x1e   : > { %s3218_s24 = scalar_lea.vmem %s4043_s0, %s2666_s21  ;;  %v474_v37 = vld [vmem:[%s4044_s2 + $0x20] sm:$0xff]  ;;  %v477_v40 = vld [vmem:[%s4044_s2 + $0x38] sm:$0xff]  ;;  %v479_v42 = vld [vmem:[%s4044_s2 + $0x48] sm:$0xff]  ;;  %s2664_s21 = sshll.u32 %s3210_s18, 1 }
  0x1f   : > { %v356_v0 = vld [vmem:[%s3218_s24 + $0x80] sm:$0xff]  ;;  %v357_v2 = vld [vmem:[%s3218_s24 + $0x88] sm:$0xff]  ;;  %v358_v4 = vld [vmem:[%s3218_s24 + $0x90] sm:$0xff]  ;;  %s3755_s22 = scalar_lea.vmem [#allocation3], %s2664_s21  ;;  %s3862_s19 = scalar_lea.vmem (%p3196_p5), %s4034_s7, %s2760_s10  }
  0x20   : > { %v340_v1 = vld [vmem:[%s3218_s24] sm:$0xff]  ;;  %404 = vxpose.xlu1.b32.start [1/16] (narrow) %v356_v0, 16  ;;  %1993 = vst.msk [vmem:[%s3223_s25 + $0x80] sm:$0xff] %vm742_vm0, %v356_v0  ;;  %1994 = vst.msk [vmem:[%s3223_s25 + $0x88] sm:$0xff] %vm742_vm0, %v357_v2  ;;  %v341_v3 = vld [vmem:[%s3218_s24 + $0x8] sm:$0xff] }
  0x21   : > { %372 = vxpose.xlu0.b32.start [1/16] (narrow) %v340_v1, 16  ;;  %1977 = vst.msk [vmem:[%s3223_s25] sm:$0xff] %vm742_vm0, %v340_v1  ;;  %v342_v5 = vld [vmem:[%s3218_s24 + $0x10] sm:$0xff]  ;;  %1978 = vst.msk [vmem:[%s3223_s25 + $0x8] sm:$0xff] %vm742_vm0, %v341_v3  ;;  %v359_v6 = vld [vmem:[%s3218_s24 + $0x98] sm:$0xff] }
  0x22   : > { %1995 = vst.msk [vmem:[%s3223_s25 + $0x90] sm:$0xff] %vm742_vm0, %v358_v4  ;;  %1979 = vst.msk [vmem:[%s3223_s25 + $0x10] sm:$0xff] %vm742_vm0, %v342_v5  ;;  %v343_v7 = vld [vmem:[%s3218_s24 + $0x18] sm:$0xff]  ;;  %v360_v8 = vld [vmem:[%s3218_s24 + $0xa0] sm:$0xff] }
  0x23   : > { %1996 = vst.msk [vmem:[%s3223_s25 + $0x98] sm:$0xff] %vm742_vm0, %v359_v6  ;;  %1980 = vst.msk [vmem:[%s3223_s25 + $0x18] sm:$0xff] %vm742_vm0, %v343_v7  ;;  %v344_v9 = vld [vmem:[%s3218_s24 + $0x20] sm:$0xff]  ;;  %v361_v10 = vld [vmem:[%s3218_s24 + $0xa8] sm:$0xff] }
  0x24   : > { %1997 = vst.msk [vmem:[%s3223_s25 + $0xa0] sm:$0xff] %vm742_vm0, %v360_v8  ;;  %v345_v11 = vld [vmem:[%s3218_s24 + $0x28] sm:$0xff]  ;;  %1981 = vst.msk [vmem:[%s3223_s25 + $0x20] sm:$0xff] %vm742_vm0, %v344_v9  ;;  %v362_v12 = vld [vmem:[%s3218_s24 + $0xb0] sm:$0xff]  ;;  %405 = vxpose.xlu1.b32.cont [2/16] (narrow) %v357_v2, 16 }
  0x25   : > { %1998 = vst.msk [vmem:[%s3223_s25 + $0xa8] sm:$0xff] %vm742_vm0, %v361_v10  ;;  %1982 = vst.msk [vmem:[%s3223_s25 + $0x28] sm:$0xff] %vm742_vm0, %v345_v11  ;;  %v346_v13 = vld [vmem:[%s3218_s24 + $0x30] sm:$0xff]  ;;  %v363_v14 = vld [vmem:[%s3218_s24 + $0xb8] sm:$0xff]  ;;  %373 = vxpose.xlu0.b32.cont [2/16] (narrow) %v341_v3, 16 }
  0x26   : > { %1999 = vst.msk [vmem:[%s3223_s25 + $0xb0] sm:$0xff] %vm742_vm0, %v362_v12  ;;  %1983 = vst.msk [vmem:[%s3223_s25 + $0x30] sm:$0xff] %vm742_vm0, %v346_v13  ;;  %v347_v15 = vld [vmem:[%s3218_s24 + $0x38] sm:$0xff]  ;;  %v364_v16 = vld [vmem:[%s3218_s24 + $0xc0] sm:$0xff] }
  0x27   : > { %2000 = vst.msk [vmem:[%s3223_s25 + $0xb8] sm:$0xff] %vm742_vm0, %v363_v14  ;;  %v348_v17 = vld [vmem:[%s3218_s24 + $0x40] sm:$0xff]  ;;  %1984 = vst.msk [vmem:[%s3223_s25 + $0x38] sm:$0xff] %vm742_vm0, %v347_v15  ;;  %v365_v18 = vld [vmem:[%s3218_s24 + $0xc8] sm:$0xff] }
  0x28   : > { %2001 = vst.msk [vmem:[%s3223_s25 + $0xc0] sm:$0xff] %vm742_vm0, %v364_v16  ;;  %1985 = vst.msk [vmem:[%s3223_s25 + $0x40] sm:$0xff] %vm742_vm0, %v348_v17  ;;  %v349_v19 = vld [vmem:[%s3218_s24 + $0x48] sm:$0xff]  ;;  %v366_v20 = vld [vmem:[%s3218_s24 + $0xd0] sm:$0xff]  ;;  %406 = vxpose.xlu1.b32.cont [3/16] (narrow) %v358_v4, 16 }
  0x29   : > { %2002 = vst.msk [vmem:[%s3223_s25 + $0xc8] sm:$0xff] %vm742_vm0, %v365_v18  ;;  %1986 = vst.msk [vmem:[%s3223_s25 + $0x48] sm:$0xff] %vm742_vm0, %v349_v19  ;;  %v350_v22 = vld [vmem:[%s3218_s24 + $0x50] sm:$0xff]  ;;  %v367_v23 = vld [vmem:[%s3218_s24 + $0xd8] sm:$0xff]  ;;  %374 = vxpose.xlu0.b32.cont [3/16] (narrow) %v342_v5, 16 }
  0x2a   : > { %2003 = vst.msk [vmem:[%s3223_s25 + $0xd0] sm:$0xff] %vm742_vm0, %v366_v20  ;;  %v351_v24 = vld [vmem:[%s3218_s24 + $0x58] sm:$0xff]  ;;  %1987 = vst.msk [vmem:[%s3223_s25 + $0x50] sm:$0xff] %vm742_vm0, %v350_v22  ;;  %v368_v25 = vld [vmem:[%s3218_s24 + $0xe0] sm:$0xff] }
  0x2b   : > { %2004 = vst.msk [vmem:[%s3223_s25 + $0xd8] sm:$0xff] %vm742_vm0, %v367_v23  ;;  %1988 = vst.msk [vmem:[%s3223_s25 + $0x58] sm:$0xff] %vm742_vm0, %v351_v24  ;;  %v352_v26 = vld [vmem:[%s3218_s24 + $0x60] sm:$0xff]  ;;  %v369_v27 = vld [vmem:[%s3218_s24 + $0xe8] sm:$0xff] }
  0x2c   : > { %2005 = vst.msk [vmem:[%s3223_s25 + $0xe0] sm:$0xff] %vm742_vm0, %v368_v25  ;;  %1989 = vst.msk [vmem:[%s3223_s25 + $0x60] sm:$0xff] %vm742_vm0, %v352_v26  ;;  %v353_v28 = vld [vmem:[%s3218_s24 + $0x68] sm:$0xff]  ;;  %v370_v29 = vld [vmem:[%s3218_s24 + $0xf0] sm:$0xff]  ;;  %407 = vxpose.xlu1.b32.cont [4/16] (narrow) %v359_v6, 16 }
  0x2d   : > { %2006 = vst.msk [vmem:[%s3223_s25 + $0xe8] sm:$0xff] %vm742_vm0, %v369_v27  ;;  %v354_v30 = vld [vmem:[%s3218_s24 + $0x70] sm:$0xff]  ;;  %1990 = vst.msk [vmem:[%s3223_s25 + $0x68] sm:$0xff] %vm742_vm0, %v353_v28  ;;  %v371_v31 = vld [vmem:[%s3218_s24 + $0xf8] sm:$0xff]  ;;  %375 = vxpose.xlu0.b32.cont [4/16] (narrow) %v343_v7, 16 }
  0x2e   : > { %2007 = vst.msk [vmem:[%s3223_s25 + $0xf0] sm:$0xff] %vm742_vm0, %v370_v29  ;;  %1991 = vst.msk [vmem:[%s3223_s25 + $0x70] sm:$0xff] %vm742_vm0, %v354_v30  ;;  %v355_v32 = vld [vmem:[%s3218_s24 + $0x78] sm:$0xff]  ;;  %v478_v41 = vld [vmem:[%s4044_s2 + $0x40] sm:$0xff] }
  0x2f   : > { %2008 = vst.msk [vmem:[%s3223_s25 + $0xf8] sm:$0xff] %vm742_vm0, %v371_v31  ;;  %1992 = vst.msk [vmem:[%s3223_s25 + $0x78] sm:$0xff] %vm742_vm0, %v355_v32  ;;  %v480_v43 = vld [vmem:[%s4044_s2 + $0x50] sm:$0xff]  ;;  %v481_v44 = vld [vmem:[%s4044_s2 + $0x58] sm:$0xff] }
  0x30   : > { %408 = vxpose.xlu1.b32.cont [5/16] (narrow) %v360_v8, 16  ;;  %v482_v45 = vld [vmem:[%s4044_s2 + $0x60] sm:$0xff]  ;;  %v483_v46 = vld [vmem:[%s4044_s2 + $0x68] sm:$0xff]  ;;  %v484_v47 = vld [vmem:[%s4044_s2 + $0x70] sm:$0xff] }
  0x31   : > { %376 = vxpose.xlu0.b32.cont [5/16] (narrow) %v344_v9, 16  ;;  %v485_v48 = vld [vmem:[%s4044_s2 + $0x78] sm:$0xff]  ;;  %v486_v49 = vld [vmem:[%s4044_s2 + $0x80] sm:$0xff]  ;;  %v487_v50 = vld [vmem:[%s4044_s2 + $0x88] sm:$0xff] }
  0x32   : > { %v488_v53 = vld [vmem:[%s4044_s2 + $0x90] sm:$0xff]  ;;  %v2873_v57 = vld [vmem:[%s4045_s1] sm:$0xff]   ;;  %v489_v58 = vld [vmem:[%s4044_s2 + $0x98] sm:$0xff] }
  0x33   : > { %v490_v59 = vld [vmem:[%s4044_s2 + $0xa0] sm:$0xff]  ;;  %v491_v60 = vld [vmem:[%s4044_s2 + $0xa8] sm:$0xff]  ;;  %v492_v61 = vld [vmem:[%s4044_s2 + $0xb0] sm:$0xff] }
  0x34   : > { %409 = vxpose.xlu1.b32.cont [6/16] (narrow) %v361_v10, 16  ;;  %v2874_v62 = vld [vmem:[%s4045_s1 + $0x8] sm:$0xff]   ;;  %v493_v63 = vld [vmem:[%s4044_s2 + $0xb8] sm:$0xff]  ;;  %v494_v0 = vld [vmem:[%s4044_s2 + $0xc0] sm:$0xff] }
  0x35   : > { %377 = vxpose.xlu0.b32.cont [6/16] (narrow) %v345_v11, 16  ;;  %v495_v1 = vld [vmem:[%s4044_s2 + $0xc8] sm:$0xff]  ;;  %v496_v2 = vld [vmem:[%s4044_s2 + $0xd0] sm:$0xff]  ;;  %v497_v4 = vld [vmem:[%s4044_s2 + $0xd8] sm:$0xff] }
  0x36   : > { %v2875_v3 = vld [vmem:[%s4045_s1 + $0x10] sm:$0xff]   ;;  %v498_v5 = vld [vmem:[%s4044_s2 + $0xe0] sm:$0xff]  ;;  %v499_v6 = vld [vmem:[%s4044_s2 + $0xe8] sm:$0xff] }
  0x37   : > { %v500_v7 = vld [vmem:[%s4044_s2 + $0xf0] sm:$0xff]  ;;  %v2876_v8 = vld [vmem:[%s4045_s1 + $0x18] sm:$0xff]   ;;  %v1119_v10 = vld [vmem:[%s4046_s4] sm:$0xff] }
  0x38   : > { %410 = vxpose.xlu1.b32.cont [7/16] (narrow) %v362_v12, 16  ;;  %v501_v9 = vld [vmem:[%s4044_s2 + $0xf8] sm:$0xff]  ;;  %v1120_v11 = vld [vmem:[%s4046_s4 + $0x8] sm:$0xff]  ;;  %v1121_v12 = vld [vmem:[%s4046_s4 + $0x10] sm:$0xff] }
  0x39   : > { %378 = vxpose.xlu0.b32.cont [7/16] (narrow) %v346_v13, 16  ;;  %v2877_v13 = vld [vmem:[%s4045_s1 + $0x20] sm:$0xff]  }
  0x3c   : > { %411 = vxpose.xlu1.b32.cont [8/16] (narrow) %v363_v14, 16  ;;  %v1122_v14 = vld [vmem:[%s4046_s4 + $0x18] sm:$0xff] }
  0x3d   : > { %379 = vxpose.xlu0.b32.cont [8/16] (narrow) %v347_v15, 16  ;;  %v1123_v15 = vld [vmem:[%s4046_s4 + $0x20] sm:$0xff] }
  0x40   : > { %412 = vxpose.xlu1.b32.cont [9/16] (narrow) %v364_v16, 16  ;;  %v1124_v16 = vld [vmem:[%s4046_s4 + $0x28] sm:$0xff] }
  0x41   : > { %380 = vxpose.xlu0.b32.cont [9/16] (narrow) %v348_v17, 16  ;;  %v1125_v17 = vld [vmem:[%s4046_s4 + $0x30] sm:$0xff] }
  0x44   : > { %413 = vxpose.xlu1.b32.cont [10/16] (narrow) %v365_v18, 16  ;;  %v2878_v18 = vld [vmem:[%s4045_s1 + $0x28] sm:$0xff]  }
  0x45   : > { %381 = vxpose.xlu0.b32.cont [10/16] (narrow) %v349_v19, 16  ;;  %v1126_v19 = vld [vmem:[%s4046_s4 + $0x38] sm:$0xff] }
  0x48   : > { %414 = vxpose.xlu1.b32.cont [11/16] (narrow) %v366_v20, 16  ;;  %v1127_v20 = vld [vmem:[%s4046_s4 + $0x40] sm:$0xff] }
  0x49   : > { %382 = vxpose.xlu0.b32.cont [11/16] (narrow) %v350_v22, 16  ;;  %v1128_v22 = vld [vmem:[%s4046_s4 + $0x48] sm:$0xff] }
  0x4c   : > { %415 = vxpose.xlu1.b32.cont [12/16] (narrow) %v367_v23, 16  ;;  %v1129_v23 = vld [vmem:[%s4046_s4 + $0x50] sm:$0xff] }
  0x4d   : > { %383 = vxpose.xlu0.b32.cont [12/16] (narrow) %v351_v24, 16  ;;  %v2879_v24 = vld [vmem:[%s4045_s1 + $0x30] sm:$0xff]  }
  0x50   : > { %416 = vxpose.xlu1.b32.cont [13/16] (narrow) %v368_v25, 16  ;;  %v1130_v25 = vld [vmem:[%s4046_s4 + $0x58] sm:$0xff] }
  0x51   : > { %384 = vxpose.xlu0.b32.cont [13/16] (narrow) %v352_v26, 16  ;;  %v1131_v26 = vld [vmem:[%s4046_s4 + $0x60] sm:$0xff] }
  0x54   : > { %417 = vxpose.xlu1.b32.cont [14/16] (narrow) %v369_v27, 16  ;;  %v1132_v27 = vld [vmem:[%s4046_s4 + $0x68] sm:$0xff] }
  0x55   : > { %385 = vxpose.xlu0.b32.cont [14/16] (narrow) %v353_v28, 16  ;;  %v1133_v28 = vld [vmem:[%s4046_s4 + $0x70] sm:$0xff] }
  0x58   : > { %418 = vxpose.xlu1.b32.cont [15/16] (narrow) %v370_v29, 16  ;;  %v2880_v29 = vld [vmem:[%s4045_s1 + $0x38] sm:$0xff]  }
  0x59   : > { %386 = vxpose.xlu0.b32.cont [15/16] (narrow) %v354_v30, 16  ;;  %v1134_v30 = vld [vmem:[%s4046_s4 + $0x78] sm:$0xff] }
  0x5c   : > { %419 = vxpose.xlu1.b32.end [16/16] (narrow) %v371_v31, 16  ;;  %v1135_v31 = vld [vmem:[%s4046_s4 + $0x80] sm:$0xff] }
  0x5d   : > { %387 = vxpose.xlu0.b32.end [16/16] (narrow) %v355_v32, 16  ;;  %v1136_v32 = vld [vmem:[%s4046_s4 + $0x88] sm:$0xff] }
  0x7a   : > { %2872 = vset.pattern.permute.xlu1 %v3109_v21 }
  0x7b   : > { %509 = vperm.xlu1 %2872, %v471_v33   ;;  %v1137_v33 = vld [vmem:[%s4046_s4 + $0x90] sm:$0xff] }
  0x7f   : > { %514 = vperm.xlu1 %2872, %v472_v34   ;;  %v2881_v34 = vld [vmem:[%s4045_s1 + $0x40] sm:$0xff]  }
  0x83   : > { %519 = vperm.xlu1 %2872, %v473_v35   ;;  %v1138_v35 = vld [vmem:[%s4046_s4 + $0x98] sm:$0xff] }
  0x86   : > { %2871 = vset.pattern.permute.xlu0 %v3109_v21 }
  0x87   : > { %504 = vperm.xlu0 %2871, %v470_v36   ;;  %524 = vperm.xlu1 %2872, %v474_v37   ;;  %v1139_v36 = vld [vmem:[%s4046_s4 + $0xa0] sm:$0xff]  ;;  %v1140_v37 = vld [vmem:[%s4046_s4 + $0xa8] sm:$0xff] }
  0x8b   : > { %529 = vperm.xlu0 %2871, %v475_v38   ;;  %534 = vperm.xlu1 %2872, %v476_v39   ;;  %v1141_v38 = vld [vmem:[%s4046_s4 + $0xb0] sm:$0xff]  ;;  %v2882_v39 = vld [vmem:[%s4045_s1 + $0x48] sm:$0xff]  }
  0x8f   : > { %539 = vperm.xlu0 %2871, %v477_v40   ;;  %544 = vperm.xlu1 %2872, %v478_v41   ;;  %v1142_v40 = vld [vmem:[%s4046_s4 + $0xb8] sm:$0xff]  ;;  %v1143_v41 = vld [vmem:[%s4046_s4 + $0xc0] sm:$0xff] }
  0x93   : > { %549 = vperm.xlu0 %2871, %v479_v42   ;;  %554 = vperm.xlu1 %2872, %v480_v43   ;;  %v1144_v42 = vld [vmem:[%s4046_s4 + $0xc8] sm:$0xff]  ;;  %v1145_v43 = vld [vmem:[%s4046_s4 + $0xd0] sm:$0xff] }
  0x97   : > { %559 = vperm.xlu0 %2871, %v481_v44   ;;  %564 = vperm.xlu1 %2872, %v482_v45   ;;  %v2883_v44 = vld [vmem:[%s4045_s1 + $0x50] sm:$0xff]   ;;  %v1146_v45 = vld [vmem:[%s4046_s4 + $0xd8] sm:$0xff] }
  0x9b   : > { %569 = vperm.xlu0 %2871, %v483_v46   ;;  %574 = vperm.xlu1 %2872, %v484_v47   ;;  %v1147_v46 = vld [vmem:[%s4046_s4 + $0xe0] sm:$0xff]  ;;  %v1148_v47 = vld [vmem:[%s4046_s4 + $0xe8] sm:$0xff] }
  0x9f   : > { %579 = vperm.xlu0 %2871, %v485_v48   ;;  %584 = vperm.xlu1 %2872, %v486_v49   ;;  %v1149_v48 = vld [vmem:[%s4046_s4 + $0xf0] sm:$0xff]  ;;  %v2884_v49 = vld [vmem:[%s4045_s1 + $0x58] sm:$0xff]  }
  0xa0   : > { %v420_v51 = vpop.trf.xlu1 }
  0xa1   : > { %v388_v52 = vpop.trf.xlu0  ;;  %v469_v54 = vpack.c.bf16 %v420_v51, %v420_v51  ;;  %v1768_v51 = vld [vmem:[%s4033_s6] sm:$0xff] }
  0xa2   : > { %v468_v55 = vpack.c.bf16 %v388_v52, %v388_v52  ;;  %v1770_v52 = vld [vmem:[%s4033_s6 + $0x10] sm:$0xff] }
  0xa3   : > { %589 = vperm.xlu0 %2871, %v487_v50   ;;  %2683 = vmatprep.subr.msk.bf16.mxu0 %vm791_vm1, %v469_v54  ;;  %v1150_v50 = vld [vmem:[%s4046_s4 + $0xf8] sm:$0xff]  ;;  %v2885_v54 = vld [vmem:[%s4045_s1 + $0x60] sm:$0xff]  }
  0xa4   : > { %v793_v56 = vsel %vm791_vm1, %v468_v55, 0  ;;  %594 = vperm.xlu1 %2872, %v488_v53   ;;  %v1772_v53 = vld [vmem:[%s4033_s6 + $0x20] sm:$0xff]  ;;  %v1774_v55 = vld [vmem:[%s4033_s6 + $0x30] sm:$0xff] }
  0xa5   : > { %799 = vmatpush1.bf16.msra.mxu0 %v793_v56  ;;  %v1769_v56 = vld [vmem:[%s4033_s6 + $0x8] sm:$0xff] }
  0xa7   : > { %599 = vperm.xlu0 %2871, %v489_v58   ;;  %v1773_v58 = vld [vmem:[%s4033_s6 + $0x28] sm:$0xff] }
  0xa8   : > { %2684 = vmatmul.mubr.msk.bf16.vlgmr.msra.gmra.mrb[0].mxu0 %vm742_vm0, %v2873_v57  ;;  %604 = vperm.xlu1 %2872, %v490_v59   ;;  %v1771_v57 = vld [vmem:[%s4033_s6 + $0x18] sm:$0xff]  ;;  %v2886_v59 = vld [vmem:[%s4045_s1 + $0x68] sm:$0xff]  }
  0xa9   : > { %840 = vmatprep.mubr.bf16.mxu0 %v3109_v21 }
  0xab   : > { %609 = vperm.xlu0 %2871, %v491_v60   ;;  %v1775_v60 = vld [vmem:[%s4033_s6 + $0x38] sm:$0xff] }
  0xac   : > { %614 = vperm.xlu1 %2872, %v492_v61   ;;  %v2887_v61 = vld [vmem:[%s4045_s1 + $0x70] sm:$0xff]  }
  0xaf   : > { %619 = vperm.xlu0 %2871, %v493_v63   ;;  %v3616_v63 = vpop.trf.xlu1 }
  0xb0   : > { %2685 = vmatmul.mubr.msk.bf16.gmra.mrb[4].mxu0 %vm742_vm0, %v2874_v62  ;;  %624 = vperm.xlu1 %2872, %v494_v0   ;;  %v2888_v62 = vld [vmem:[%s4045_s1 + $0x78] sm:$0xff]   ;;  %v3618_v0 = vpop.trf.xlu0 }
  0xb1   : > { %850 = vmatprep.mubr.bf16.mxu0 %v3109_v21 }
  0xb3   : > { %629 = vperm.xlu0 %2871, %v495_v1  }
  0xb4   : > { %634 = vperm.xlu1 %2872, %v496_v2  }
  0xb7   : > { %639 = vperm.xlu0 %2871, %v497_v4  }
  0xb8   : > { %2686 = vmatmul.mubr.msk.bf16.gmra.mrb[8].mxu0 %vm742_vm0, %v2875_v3  ;;  %644 = vperm.xlu1 %2872, %v498_v5  }
  0xb9   : > { %860 = vmatprep.mubr.bf16.mxu0 %v3109_v21 }
  0xbb   : > { %649 = vperm.xlu0 %2871, %v499_v6  }
  0xbc   : > { %654 = vperm.xlu1 %2872, %v500_v7  }
  0xbf   : > { %659 = vperm.xlu0 %2871, %v501_v9  }
  0xc0   : > { %2687 = vmatmul.mubr.msk.bf16.gmra.mrb[12].mxu0 %vm742_vm0, %v2876_v8  ;;  %1153 = vperm.xlu1 %2872, %v1119_v10  }
  0xc1   : > { %870 = vmatprep.mubr.bf16.mxu0 %v3109_v21 }
  0xc3   : > { %1158 = vperm.xlu0 %2871, %v1120_v11  }
  0xc4   : > { %1163 = vperm.xlu1 %2872, %v1121_v12  }
  0xc7   : > { %1168 = vperm.xlu0 %2871, %v1122_v14  }
  0xc8   : > { %2688 = vmatmul.mubr.msk.bf16.gmra.mrb[16].mxu0 %vm742_vm0, %v2877_v13  ;;  %1173 = vperm.xlu1 %2872, %v1123_v15  }
  0xc9   : > { %880 = vmatprep.mubr.bf16.mxu0 %v3109_v21 }
  0xcb   : > { %1178 = vperm.xlu0 %2871, %v1124_v16  }
  0xcc   : > { %1183 = vperm.xlu1 %2872, %v1125_v17  }
  0xcf   : > { %1188 = vperm.xlu0 %2871, %v1126_v19  }
  0xd0   : > { %2689 = vmatmul.mubr.msk.bf16.gmra.mrb[20].mxu0 %vm742_vm0, %v2878_v18  ;;  %1193 = vperm.xlu1 %2872, %v1127_v20  }
  0xd1   : > { %890 = vmatprep.mubr.bf16.mxu0 %v3109_v21 }
  0xd3   : > { %1198 = vperm.xlu0 %2871, %v1128_v22  }
  0xd4   : > { %1203 = vperm.xlu1 %2872, %v1129_v23  }
  0xd7   : > { %1208 = vperm.xlu0 %2871, %v1130_v25  }
  0xd8   : > { %2690 = vmatmul.mubr.msk.bf16.gmra.mrb[24].mxu0 %vm742_vm0, %v2879_v24  ;;  %1213 = vperm.xlu1 %2872, %v1131_v26  }
  0xd9   : > { %900 = vmatprep.mubr.bf16.mxu0 %v3109_v21 }
  0xdb   : > { %1218 = vperm.xlu0 %2871, %v1132_v27  }
  0xdc   : > { %1223 = vperm.xlu1 %2872, %v1133_v28  }
  0xdf   : > { %1228 = vperm.xlu0 %2871, %v1134_v30  }
  0xe0   : > { %2691 = vmatmul.mubr.msk.bf16.gmra.mrb[28].mxu0 %vm742_vm0, %v2880_v29  ;;  %1233 = vperm.xlu1 %2872, %v1135_v31  }
  0xe1   : > { %910 = vmatprep.mubr.bf16.mxu0 %v3109_v21 }
  0xe3   : > { %1238 = vperm.xlu0 %2871, %v1136_v32  }
  0xe4   : > { %1243 = vperm.xlu1 %2872, %v1137_v33  }
  0xe7   : > { %1248 = vperm.xlu0 %2871, %v1138_v35  }
  0xe8   : > { %2692 = vmatmul.mubr.msk.bf16.gmra.mrb[32].mxu0 %vm742_vm0, %v2881_v34  ;;  %1253 = vperm.xlu1 %2872, %v1139_v36  }
  0xe9   : > { %920 = vmatprep.mubr.bf16.mxu0 %v3109_v21 }
  0xeb   : > { %1258 = vperm.xlu0 %2871, %v1140_v37  }
  0xec   : > { %1263 = vperm.xlu1 %2872, %v1141_v38  }
  0xef   : > { %1268 = vperm.xlu0 %2871, %v1142_v40  }
  0xf0   : > { %2693 = vmatmul.mubr.msk.bf16.gmra.mrb[36].mxu0 %vm742_vm0, %v2882_v39  ;;  %1273 = vperm.xlu1 %2872, %v1143_v41  }
  0xf1   : > { %930 = vmatprep.mubr.bf16.mxu0 %v3109_v21 }
  0xf3   : > { %1278 = vperm.xlu0 %2871, %v1144_v42  }
  0xf4   : > { %1283 = vperm.xlu1 %2872, %v1145_v43  }
  0xf7   : > { %1288 = vperm.xlu0 %2871, %v1146_v45  }
  0xf8   : > { %2694 = vmatmul.mubr.msk.bf16.gmra.mrb[40].mxu0 %vm742_vm0, %v2883_v44  ;;  %1293 = vperm.xlu1 %2872, %v1147_v46  }
  0xf9   : > { %940 = vmatprep.mubr.bf16.mxu0 %v3109_v21 }
  0xfa   : > { %v510_v1 = vpop.permute.xlu1 %509 }
  0xfb   : > { %1298 = vperm.xlu0 %2871, %v1148_v47  }
  0xfc   : > { %1303 = vperm.xlu1 %2872, %v1149_v48  }
  0xfe   : > { %v515_v10 = vpop.permute.xlu1 %514 }
  0xff   : > { %1308 = vperm.xlu0 %2871, %v1150_v50  }
 0x100   : > { %2695 = vmatmul.mubr.msk.bf16.gmra.mrb[44].mxu0 %vm742_vm0, %v2884_v49  ;;  %1778 = vperm.xlu1 %2872, %v1768_v51  }
 0x101   : > { %950 = vmatprep.mubr.bf16.mxu0 %v3109_v21 }
 0x102   : > { %v520_v22 = vpop.permute.xlu1 %519 }
 0x103   : > { %1788 = vperm.xlu0 %2871, %v1770_v52  }
 0x104   : > { %1798 = vperm.xlu1 %2872, %v1772_v53  }
 0x106   : > { %v505_v2 = vpop.permute.xlu0 %504  ;;  %v525_v33 = vpop.permute.xlu1 %524 }
 0x107   : > { %1808 = vperm.xlu0 %2871, %v1774_v55  }
 0x108   : > { %2696 = vmatmul.mubr.msk.bf16.gmra.mrb[48].mxu0 %vm742_vm0, %v2885_v54  ;;  %1783 = vperm.xlu1 %2872, %v1769_v56  }
 0x109   : > { %960 = vmatprep.mubr.bf16.mxu0 %v3109_v21 }
 0x10a   : > { %v530_v38 = vpop.permute.xlu0 %529  ;;  %v535_v49 = vpop.permute.xlu1 %534 }
 0x10b   : > { %1793 = vperm.xlu0 %2871, %v1771_v57  }
 0x10c   : > { %1803 = vperm.xlu1 %2872, %v1773_v58  }
 0x10e   : > { %v540_v54 = vpop.permute.xlu0 %539 }
 0x10f   : > { %1813 = vperm.xlu0 %2871, %v1775_v60  }
 0x110   : > { %2697 = vmatmul.mubr.msk.bf16.gmra.mrb[52].mxu0 %vm742_vm0, %v2886_v59 }
 0x111   : > { %970 = vmatprep.mubr.bf16.mxu0 %v3109_v21 }
 0x118   : > { %2698 = vmatmul.mubr.msk.bf16.gmra.mrb[56].mxu0 %vm742_vm0, %v2887_v61 }
 0x119   : > { %980 = vmatprep.mubr.bf16.mxu0 %v3109_v21  ;;  %v2891_v21 = vld [vmem:[%s4047_s3 + $0x4] ss:$8 sps:$4 sm:$0xff]  }
 0x11a   : > { %1503 = vmatprep.mubr.bf16.mxu1 %v2891_v21 }
 0x120   : > { %2699 = vmatmul.mubr.msk.bf16.gmra.mrb[60].mxu0 %vm742_vm0, %v2888_v62 }
 0x17b   : > { %v832_v3 = vpop.f32.mrb[0].mxu0 }
 0x17c   : > { %v833_v4 = vadd.f32 %v832_v3, %v505_v2  ;;  %v834_v5 = vpop.f32.mrb[1].mxu0  ;;  %v545_v3 = vpop.permute.xlu1 %544 }
 0x17d   : > { %v835_v6 = vadd.f32 %v834_v5, %v505_v2  ;;  %v836_v7 = vpop.f32.mrb[2].mxu0 }
 0x17e   : > { %v837_v8 = vadd.f32 %v836_v7, %v510_v1  ;;  %v838_v9 = vpop.f32.mrb[3].mxu0  ;;  %v991_v12 = vmax.f32 %v833_v4, 0.0 }
 0x17f   : > { %v839_v11 = vadd.f32 %v838_v9, %v510_v1  ;;  %v992_v14 = vmax.f32 %v835_v6, 0.0 }
 0x180   : > { %v993_v13 = vmax.f32 %v837_v8, 0.0  ;;  %v550_v8 = vpop.permute.xlu0 %549 }
 0x181   : > { %v994_v15 = vmax.f32 %v839_v11, 0.0 }
 0x182   : > { %v1055_v16 = vpack.c.bf16 %v993_v13, %v991_v12 }
 0x183   : > { %v842_v17 = vpop.f32.mrb[4].mxu0  ;;  %v1056_v18 = vpack.c.bf16 %v994_v15, %v992_v14 }
 0x184   : > { %v843_v19 = vadd.f32 %v842_v17, %v515_v10  ;;  %v844_v20 = vpop.f32.mrb[5].mxu0 }
 0x185   : > { %v845_v23 = vadd.f32 %v844_v20, %v515_v10  ;;  %v846_v24 = vpop.f32.mrb[6].mxu0  ;;  %1471 = vmatprep.subr.bf16.mxu1 %v1056_v18  ;;  %v555_v18 = vpop.permute.xlu1 %554 }
 0x186   : > { %v847_v25 = vadd.f32 %v846_v24, %v520_v22  ;;  %v848_v26 = vpop.f32.mrb[7].mxu0  ;;  %1472 = vmatpush1.bf16.msra.mxu1 %v1055_v16  ;;  %v995_v28 = vmax.f32 %v843_v19, 0.0  ;;  %v560_v24 = vpop.permute.xlu0 %559 }
 0x187   : > { %v849_v27 = vadd.f32 %v848_v26, %v520_v22  ;;  %v996_v30 = vmax.f32 %v845_v23, 0.0 }
 0x188   : > { %v997_v29 = vmax.f32 %v847_v25, 0.0 }
 0x189   : > { %v998_v31 = vmax.f32 %v849_v27, 0.0 }
 0x18a   : > { %v1057_v32 = vpack.c.bf16 %v997_v29, %v995_v28 }
 0x18b   : > { %v1058_v34 = vpack.c.bf16 %v998_v31, %v996_v30  ;;  %v852_v35 = vpop.f32.mrb[8].mxu0 }
 0x18c   : > { %v853_v36 = vadd.f32 %v852_v35, %v525_v33  ;;  %v854_v37 = vpop.f32.mrb[9].mxu0  ;;  %v565_v35 = vpop.permute.xlu1 %564 }
 0x18d   : > { %v855_v39 = vadd.f32 %v854_v37, %v525_v33  ;;  %v856_v40 = vpop.f32.mrb[10].mxu0  ;;  %1473 = vmatprep.subr.bf16.mxu1 %v1058_v34 }
 0x18e   : > { %v857_v41 = vadd.f32 %v856_v40, %v530_v38  ;;  %v858_v42 = vpop.f32.mrb[11].mxu0  ;;  %1474 = vmatpush1.bf16.msra.mxu1 %v1057_v32  ;;  %v999_v44 = vmax.f32 %v853_v36, 0.0  ;;  %v570_v40 = vpop.permute.xlu0 %569 }
 0x18f   : > { %v859_v43 = vadd.f32 %v858_v42, %v530_v38  ;;  %v1000_v46 = vmax.f32 %v855_v39, 0.0 }
 0x190   : > { %v1001_v45 = vmax.f32 %v857_v41, 0.0 }
 0x191   : > { %v1002_v47 = vmax.f32 %v859_v43, 0.0 }
 0x192   : > { %v1059_v48 = vpack.c.bf16 %v1001_v45, %v999_v44 }
 0x193   : > { %v1060_v50 = vpack.c.bf16 %v1002_v47, %v1000_v46  ;;  %v862_v51 = vpop.f32.mrb[12].mxu0 }
 0x194   : > { %v863_v52 = vadd.f32 %v862_v51, %v535_v49  ;;  %v864_v53 = vpop.f32.mrb[13].mxu0  ;;  %v575_v51 = vpop.permute.xlu1 %574 }
 0x195   : > { %v865_v55 = vadd.f32 %v864_v53, %v535_v49  ;;  %v866_v56 = vpop.f32.mrb[14].mxu0  ;;  %1475 = vmatprep.subr.bf16.mxu1 %v1060_v50 }
 0x196   : > { %v867_v57 = vadd.f32 %v866_v56, %v540_v54  ;;  %v868_v58 = vpop.f32.mrb[15].mxu0  ;;  %1476 = vmatpush1.bf16.msra.mxu1 %v1059_v48  ;;  %v1003_v60 = vmax.f32 %v863_v52, 0.0  ;;  %v580_v56 = vpop.permute.xlu0 %579 }
 0x197   : > { %v869_v59 = vadd.f32 %v868_v58, %v540_v54  ;;  %v1004_v62 = vmax.f32 %v865_v55, 0.0 }
 0x198   : > { %v1005_v61 = vmax.f32 %v867_v57, 0.0 }
 0x199   : > { %v1006_v1 = vmax.f32 %v869_v59, 0.0 }
 0x19a   : > { %v1061_v2 = vpack.c.bf16 %v1005_v61, %v1003_v60 }
 0x19b   : > { %v1062_v4 = vpack.c.bf16 %v1006_v1, %v1004_v62  ;;  %v872_v5 = vpop.f32.mrb[16].mxu0 }
 0x19c   : > { %v873_v6 = vadd.f32 %v872_v5, %v545_v3  ;;  %v874_v7 = vpop.f32.mrb[17].mxu0  ;;  %v585_v5 = vpop.permute.xlu1 %584 }
 0x19d   : > { %v875_v9 = vadd.f32 %v874_v7, %v545_v3  ;;  %v876_v21 = vpop.f32.mrb[18].mxu0  ;;  %1477 = vmatprep.subr.bf16.mxu1 %v1062_v4 }
 0x19e   : > { %v877_v10 = vadd.f32 %v876_v21, %v550_v8  ;;  %v878_v11 = vpop.f32.mrb[19].mxu0  ;;  %1478 = vmatpush1.bf16.msra.mxu1 %v1061_v2  ;;  %v1007_v13 = vmax.f32 %v873_v6, 0.0  ;;  %v590_v21 = vpop.permute.xlu0 %589 }
 0x19f   : > { %v879_v12 = vadd.f32 %v878_v11, %v550_v8  ;;  %v1008_v15 = vmax.f32 %v875_v9, 0.0 }
 0x1a0   : > { %v1009_v14 = vmax.f32 %v877_v10, 0.0 }
 0x1a1   : > { %v1010_v16 = vmax.f32 %v879_v12, 0.0 }
 0x1a2   : > { %v1063_v17 = vpack.c.bf16 %v1009_v14, %v1007_v13 }
 0x1a3   : > { %v1064_v19 = vpack.c.bf16 %v1010_v16, %v1008_v15  ;;  %v882_v20 = vpop.f32.mrb[20].mxu0 }
 0x1a4   : > { %v883_v22 = vadd.f32 %v882_v20, %v555_v18  ;;  %v884_v23 = vpop.f32.mrb[21].mxu0  ;;  %v595_v20 = vpop.permute.xlu1 %594 }
 0x1a5   : > { %v885_v25 = vadd.f32 %v884_v23, %v555_v18  ;;  %v886_v26 = vpop.f32.mrb[22].mxu0  ;;  %1479 = vmatprep.subr.bf16.mxu1 %v1064_v19 }
 0x1a6   : > { %v887_v27 = vadd.f32 %v886_v26, %v560_v24  ;;  %v888_v28 = vpop.f32.mrb[23].mxu0  ;;  %1480 = vmatpush1.bf16.msra.mxu1 %v1063_v17  ;;  %v1011_v30 = vmax.f32 %v883_v22, 0.0  ;;  %v600_v26 = vpop.permute.xlu0 %599 }
 0x1a7   : > { %v889_v29 = vadd.f32 %v888_v28, %v560_v24  ;;  %v1012_v32 = vmax.f32 %v885_v25, 0.0 }
 0x1a8   : > { %v1013_v31 = vmax.f32 %v887_v27, 0.0 }
 0x1a9   : > { %v1014_v33 = vmax.f32 %v889_v29, 0.0 }
 0x1aa   : > { %v1065_v34 = vpack.c.bf16 %v1013_v31, %v1011_v30 }
 0x1ab   : > { %v1066_v36 = vpack.c.bf16 %v1014_v33, %v1012_v32  ;;  %v892_v37 = vpop.f32.mrb[24].mxu0 }
 0x1ac   : > { %v893_v38 = vadd.f32 %v892_v37, %v565_v35  ;;  %v894_v39 = vpop.f32.mrb[25].mxu0  ;;  %v605_v37 = vpop.permute.xlu1 %604 }
 0x1ad   : > { %v895_v41 = vadd.f32 %v894_v39, %v565_v35  ;;  %v896_v42 = vpop.f32.mrb[26].mxu0  ;;  %1481 = vmatprep.subr.bf16.mxu1 %v1066_v36 }
 0x1ae   : > { %v897_v43 = vadd.f32 %v896_v42, %v570_v40  ;;  %v898_v44 = vpop.f32.mrb[27].mxu0  ;;  %1482 = vmatpush1.bf16.msra.mxu1 %v1065_v34  ;;  %v1015_v46 = vmax.f32 %v893_v38, 0.0  ;;  %v610_v42 = vpop.permute.xlu0 %609 }
 0x1af   : > { %v899_v45 = vadd.f32 %v898_v44, %v570_v40  ;;  %v1016_v48 = vmax.f32 %v895_v41, 0.0 }
 0x1b0   : > { %v1017_v47 = vmax.f32 %v897_v43, 0.0 }
 0x1b1   : > { %v1018_v49 = vmax.f32 %v899_v45, 0.0 }
 0x1b2   : > { %v1067_v50 = vpack.c.bf16 %v1017_v47, %v1015_v46 }
 0x1b3   : > { %v1068_v52 = vpack.c.bf16 %v1018_v49, %v1016_v48  ;;  %v902_v53 = vpop.f32.mrb[28].mxu0 }
 0x1b4   : > { %v903_v54 = vadd.f32 %v902_v53, %v575_v51  ;;  %v904_v55 = vpop.f32.mrb[29].mxu0  ;;  %v615_v53 = vpop.permute.xlu1 %614 }
 0x1b5   : > { %v905_v57 = vadd.f32 %v904_v55, %v575_v51  ;;  %v906_v58 = vpop.f32.mrb[30].mxu0  ;;  %1483 = vmatprep.subr.bf16.mxu1 %v1068_v52 }
 0x1b6   : > { %v907_v59 = vadd.f32 %v906_v58, %v580_v56  ;;  %v908_v60 = vpop.f32.mrb[31].mxu0  ;;  %1484 = vmatpush1.bf16.msra.mxu1 %v1067_v50  ;;  %v1019_v62 = vmax.f32 %v903_v54, 0.0  ;;  %v620_v58 = vpop.permute.xlu0 %619 }
 0x1b7   : > { %v909_v61 = vadd.f32 %v908_v60, %v580_v56  ;;  %v1020_v2 = vmax.f32 %v905_v57, 0.0 }
 0x1b8   : > { %v1021_v1 = vmax.f32 %v907_v59, 0.0 }
 0x1b9   : > { %v1022_v3 = vmax.f32 %v909_v61, 0.0 }
 0x1ba   : > { %v1069_v4 = vpack.c.bf16 %v1021_v1, %v1019_v62 }
 0x1bb   : > { %v1070_v6 = vpack.c.bf16 %v1022_v3, %v1020_v2  ;;  %v912_v7 = vpop.f32.mrb[32].mxu0 }
 0x1bc   : > { %v913_v8 = vadd.f32 %v912_v7, %v585_v5  ;;  %v914_v9 = vpop.f32.mrb[33].mxu0  ;;  %v625_v7 = vpop.permute.xlu1 %624 }
 0x1bd   : > { %v915_v10 = vadd.f32 %v914_v9, %v585_v5  ;;  %v916_v11 = vpop.f32.mrb[34].mxu0  ;;  %1485 = vmatprep.subr.bf16.mxu1 %v1070_v6 }
 0x1be   : > { %v917_v12 = vadd.f32 %v916_v11, %v590_v21  ;;  %v918_v13 = vpop.f32.mrb[35].mxu0  ;;  %1486 = vmatpush1.bf16.msra.mxu1 %v1069_v4  ;;  %v1023_v15 = vmax.f32 %v913_v8, 0.0  ;;  %v630_v11 = vpop.permute.xlu0 %629 }
 0x1bf   : > { %v919_v14 = vadd.f32 %v918_v13, %v590_v21  ;;  %v1024_v17 = vmax.f32 %v915_v10, 0.0 }
 0x1c0   : > { %v1025_v16 = vmax.f32 %v917_v12, 0.0 }
 0x1c1   : > { %v1026_v18 = vmax.f32 %v919_v14, 0.0 }
 0x1c2   : > { %v1071_v19 = vpack.c.bf16 %v1025_v16, %v1023_v15 }
 0x1c3   : > { %v1072_v22 = vpack.c.bf16 %v1026_v18, %v1024_v17  ;;  %v922_v23 = vpop.f32.mrb[36].mxu0 }
 0x1c4   : > { %v923_v24 = vadd.f32 %v922_v23, %v595_v20  ;;  %v924_v25 = vpop.f32.mrb[37].mxu0  ;;  %v635_v23 = vpop.permute.xlu1 %634 }
 0x1c5   : > { %v925_v27 = vadd.f32 %v924_v25, %v595_v20  ;;  %v926_v28 = vpop.f32.mrb[38].mxu0  ;;  %1487 = vmatprep.subr.bf16.mxu1 %v1072_v22 }
 0x1c6   : > { %v927_v29 = vadd.f32 %v926_v28, %v600_v26  ;;  %v928_v30 = vpop.f32.mrb[39].mxu0  ;;  %1488 = vmatpush1.bf16.msra.mxu1 %v1071_v19  ;;  %v1027_v32 = vmax.f32 %v923_v24, 0.0  ;;  %v640_v28 = vpop.permute.xlu0 %639 }
 0x1c7   : > { %v929_v31 = vadd.f32 %v928_v30, %v600_v26  ;;  %v1028_v34 = vmax.f32 %v925_v27, 0.0 }
 0x1c8   : > { %v1029_v33 = vmax.f32 %v927_v29, 0.0 }
 0x1c9   : > { %v1030_v35 = vmax.f32 %v929_v31, 0.0 }
 0x1ca   : > { %v1073_v36 = vpack.c.bf16 %v1029_v33, %v1027_v32 }
 0x1cb   : > { %v1074_v38 = vpack.c.bf16 %v1030_v35, %v1028_v34  ;;  %v932_v39 = vpop.f32.mrb[40].mxu0 }
 0x1cc   : > { %v933_v40 = vadd.f32 %v932_v39, %v605_v37  ;;  %v934_v41 = vpop.f32.mrb[41].mxu0  ;;  %v645_v39 = vpop.permute.xlu1 %644 }
 0x1cd   : > { %v935_v43 = vadd.f32 %v934_v41, %v605_v37  ;;  %v936_v44 = vpop.f32.mrb[42].mxu0  ;;  %1489 = vmatprep.subr.bf16.mxu1 %v1074_v38 }
 0x1ce   : > { %v937_v45 = vadd.f32 %v936_v44, %v610_v42  ;;  %v938_v46 = vpop.f32.mrb[43].mxu0  ;;  %1490 = vmatpush1.bf16.msra.mxu1 %v1073_v36  ;;  %v1031_v48 = vmax.f32 %v933_v40, 0.0  ;;  %v650_v44 = vpop.permute.xlu0 %649 }
 0x1cf   : > { %v939_v47 = vadd.f32 %v938_v46, %v610_v42  ;;  %v1032_v50 = vmax.f32 %v935_v43, 0.0 }
 0x1d0   : > { %v1033_v49 = vmax.f32 %v937_v45, 0.0 }
 0x1d1   : > { %v1034_v51 = vmax.f32 %v939_v47, 0.0 }
 0x1d2   : > { %v1075_v52 = vpack.c.bf16 %v1033_v49, %v1031_v48 }
 0x1d3   : > { %v1076_v54 = vpack.c.bf16 %v1034_v51, %v1032_v50  ;;  %v942_v55 = vpop.f32.mrb[44].mxu0 }
 0x1d4   : > { %v943_v56 = vadd.f32 %v942_v55, %v615_v53  ;;  %v944_v57 = vpop.f32.mrb[45].mxu0  ;;  %v655_v55 = vpop.permute.xlu1 %654 }
 0x1d5   : > { %v945_v59 = vadd.f32 %v944_v57, %v615_v53  ;;  %v946_v60 = vpop.f32.mrb[46].mxu0  ;;  %1491 = vmatprep.subr.bf16.mxu1 %v1076_v54 }
 0x1d6   : > { %v947_v61 = vadd.f32 %v946_v60, %v620_v58  ;;  %v948_v62 = vpop.f32.mrb[47].mxu0  ;;  %1492 = vmatpush1.bf16.msra.mxu1 %v1075_v52  ;;  %v1035_v2 = vmax.f32 %v943_v56, 0.0  ;;  %v660_v60 = vpop.permute.xlu0 %659 }
 0x1d7   : > { %v949_v1 = vadd.f32 %v948_v62, %v620_v58  ;;  %v1036_v4 = vmax.f32 %v945_v59, 0.0 }
 0x1d8   : > { %v1037_v3 = vmax.f32 %v947_v61, 0.0 }
 0x1d9   : > { %v1038_v5 = vmax.f32 %v949_v1, 0.0 }
 0x1da   : > { %v1077_v6 = vpack.c.bf16 %v1037_v3, %v1035_v2 }
 0x1db   : > { %v1078_v8 = vpack.c.bf16 %v1038_v5, %v1036_v4  ;;  %v952_v9 = vpop.f32.mrb[48].mxu0 }
 0x1dc   : > { %v953_v21 = vadd.f32 %v952_v9, %v625_v7  ;;  %v954_v10 = vpop.f32.mrb[49].mxu0 }
 0x1dd   : > { %v955_v12 = vadd.f32 %v954_v10, %v625_v7  ;;  %v956_v13 = vpop.f32.mrb[50].mxu0  ;;  %1493 = vmatprep.subr.bf16.mxu1 %v1078_v8  ;;  %v2892_v10 = vld [vmem:[%s4047_s3 + $0x14] ss:$8 sps:$4 sm:$0xff]  }
 0x1de   : > { %v957_v14 = vadd.f32 %v956_v13, %v630_v11  ;;  %v958_v15 = vpop.f32.mrb[51].mxu0  ;;  %1494 = vmatpush1.bf16.msra.mxu1 %v1077_v6  ;;  %v1039_v17 = vmax.f32 %v953_v21, 0.0  ;;  %v2889_v21 = vld [vmem:[%s4047_s3] ss:$8 sps:$4 sm:$0xff]  }
 0x1df   : > { %v959_v16 = vadd.f32 %v958_v15, %v630_v11  ;;  %v1040_v19 = vmax.f32 %v955_v12, 0.0  ;;  %v2894_v11 = vld [vmem:[%s4047_s3 + $0x10] ss:$8 sps:$4 sm:$0xff]   ;;  %v2895_v12 = vld [vmem:[%s4047_s3 + $0x24] ss:$8 sps:$4 sm:$0xff]  }
 0x1e0   : > { %v1041_v18 = vmax.f32 %v957_v14, 0.0  ;;  %v2897_v13 = vld [vmem:[%s4047_s3 + $0x20] ss:$8 sps:$4 sm:$0xff]   ;;  %v2898_v14 = vld [vmem:[%s4047_s3 + $0x34] ss:$8 sps:$4 sm:$0xff]  }
 0x1e1   : > { %v1042_v20 = vmax.f32 %v959_v16, 0.0  ;;  %v2900_v15 = vld [vmem:[%s4047_s3 + $0x30] ss:$8 sps:$4 sm:$0xff]   ;;  %v2901_v16 = vld [vmem:[%s4047_s3 + $0x44] ss:$8 sps:$4 sm:$0xff]  }
 0x1e2   : > { %v1079_v22 = vpack.c.bf16 %v1041_v18, %v1039_v17  ;;  %v2903_v17 = vld [vmem:[%s4047_s3 + $0x40] ss:$8 sps:$4 sm:$0xff]   ;;  %v2904_v18 = vld [vmem:[%s4047_s3 + $0x54] ss:$8 sps:$4 sm:$0xff]  }
 0x1e3   : > { %v1080_v24 = vpack.c.bf16 %v1042_v20, %v1040_v19  ;;  %v962_v25 = vpop.f32.mrb[52].mxu0  ;;  %v2906_v19 = vld [vmem:[%s4047_s3 + $0x50] ss:$8 sps:$4 sm:$0xff]   ;;  %v2907_v20 = vld [vmem:[%s4047_s3 + $0x64] ss:$8 sps:$4 sm:$0xff]  }
 0x1e4   : > { %v963_v26 = vadd.f32 %v962_v25, %v635_v23  ;;  %v964_v27 = vpop.f32.mrb[53].mxu0  ;;  %v2913_v25 = vld [vmem:[%s4047_s3 + $0x84] ss:$8 sps:$4 sm:$0xff]  }
 0x1e5   : > { %v965_v29 = vadd.f32 %v964_v27, %v635_v23  ;;  %v966_v30 = vpop.f32.mrb[54].mxu0  ;;  %1495 = vmatprep.subr.bf16.mxu1 %v1080_v24  ;;  %v2910_v23 = vld [vmem:[%s4047_s3 + $0x74] ss:$8 sps:$4 sm:$0xff]   ;;  %v2912_v24 = vld [vmem:[%s4047_s3 + $0x70] ss:$8 sps:$4 sm:$0xff]  }
 0x1e6   : > { %v967_v31 = vadd.f32 %v966_v30, %v640_v28  ;;  %v968_v32 = vpop.f32.mrb[55].mxu0  ;;  %1496 = vmatpush1.bf16.msra.mxu1 %v1079_v22  ;;  %v1043_v34 = vmax.f32 %v963_v26, 0.0  ;;  %v2909_v22 = vld [vmem:[%s4047_s3 + $0x60] ss:$8 sps:$4 sm:$0xff]   ;;  %v2916_v27 = vld [vmem:[%s4047_s3 + $0x94] ss:$8 sps:$4 sm:$0xff]  }
 0x1e7   : > { %v969_v33 = vadd.f32 %v968_v32, %v640_v28  ;;  %v1044_v36 = vmax.f32 %v965_v29, 0.0  ;;  %v2915_v26 = vld [vmem:[%s4047_s3 + $0x80] ss:$8 sps:$4 sm:$0xff]   ;;  %v2918_v28 = vld [vmem:[%s4047_s3 + $0x90] ss:$8 sps:$4 sm:$0xff]  }
 0x1e8   : > { %v1045_v35 = vmax.f32 %v967_v31, 0.0  ;;  %v2919_v29 = vld [vmem:[%s4047_s3 + $0xa4] ss:$8 sps:$4 sm:$0xff]   ;;  %v2921_v30 = vld [vmem:[%s4047_s3 + $0xa0] ss:$8 sps:$4 sm:$0xff]  }
 0x1e9   : > { %v1046_v37 = vmax.f32 %v969_v33, 0.0  ;;  %v2922_v31 = vld [vmem:[%s4047_s3 + $0xb4] ss:$8 sps:$4 sm:$0xff]   ;;  %v2924_v32 = vld [vmem:[%s4047_s3 + $0xb0] ss:$8 sps:$4 sm:$0xff]  }
 0x1ea   : > { %v1081_v38 = vpack.c.bf16 %v1045_v35, %v1043_v34  ;;  %v2925_v33 = vld [vmem:[%s4047_s3 + $0xc4] ss:$8 sps:$4 sm:$0xff]   ;;  %v2927_v34 = vld [vmem:[%s4047_s3 + $0xc0] ss:$8 sps:$4 sm:$0xff]   ;;  %v2928_v35 = vld [vmem:[%s4047_s3 + $0xd4] ss:$8 sps:$4 sm:$0xff]  }
 0x1eb   : > { %v1082_v40 = vpack.c.bf16 %v1046_v37, %v1044_v36  ;;  %v972_v41 = vpop.f32.mrb[56].mxu0  ;;  %v2930_v36 = vld [vmem:[%s4047_s3 + $0xd0] ss:$8 sps:$4 sm:$0xff]   ;;  %v2931_v37 = vld [vmem:[%s4047_s3 + $0xe4] ss:$8 sps:$4 sm:$0xff]  }
 0x1ec   : > { %v973_v42 = vadd.f32 %v972_v41, %v645_v39  ;;  %v974_v43 = vpop.f32.mrb[57].mxu0  ;;  %v1154_v41 = vpop.permute.xlu1 %1153 }
 0x1ed   : > { %v975_v45 = vadd.f32 %v974_v43, %v645_v39  ;;  %v976_v46 = vpop.f32.mrb[58].mxu0  ;;  %1497 = vmatprep.subr.bf16.mxu1 %v1082_v40  ;;  %v2934_v39 = vld [vmem:[%s4047_s3 + $0xf4] ss:$8 sps:$4 sm:$0xff]   ;;  %v2936_v40 = vld [vmem:[%s4047_s3 + $0xf0] ss:$8 sps:$4 sm:$0xff]  }
 0x1ee   : > { %v977_v47 = vadd.f32 %v976_v46, %v650_v44  ;;  %v978_v48 = vpop.f32.mrb[59].mxu0  ;;  %1498 = vmatpush1.bf16.msra.mxu1 %v1081_v38  ;;  %v1047_v50 = vmax.f32 %v973_v42, 0.0  ;;  %v2933_v38 = vld [vmem:[%s4047_s3 + $0xe0] ss:$8 sps:$4 sm:$0xff]  }
 0x1ef   : > { %v979_v49 = vadd.f32 %v978_v48, %v650_v44  ;;  %v1048_v52 = vmax.f32 %v975_v45, 0.0  ;;  %v1159_v45 = vpop.permute.xlu0 %1158 }
 0x1f0   : > { %v1049_v51 = vmax.f32 %v977_v47, 0.0 }
 0x1f1   : > { %v1050_v53 = vmax.f32 %v979_v49, 0.0 }
 0x1f2   : > { %v1083_v54 = vpack.c.bf16 %v1049_v51, %v1047_v50  ;;  %v2939_v50 = vld [vmem:[%s4032_s5 + $0x4] ss:$8 sps:$4 sm:$0xff]  }
 0x1f3   : > { %v1084_v56 = vpack.c.bf16 %v1050_v53, %v1048_v52  ;;  %v982_v57 = vpop.f32.mrb[60].mxu0  ;;  %1888 = vmatprep.mubr.bf16.mxu0 %v2939_v50 }
 0x1f4   : > { %v983_v58 = vadd.f32 %v982_v57, %v655_v55  ;;  %v984_v59 = vpop.f32.mrb[61].mxu0  ;;  %v1164_v57 = vpop.permute.xlu1 %1163 }
 0x1f5   : > { %v985_v61 = vadd.f32 %v984_v59, %v655_v55  ;;  %v986_v62 = vpop.f32.mrb[62].mxu0  ;;  %1499 = vmatprep.subr.bf16.mxu1 %v1084_v56 }
 0x1f6   : > { %v987_v1 = vadd.f32 %v986_v62, %v660_v60  ;;  %v988_v2 = vpop.f32.mrb[63].mxu0  ;;  %1500 = vmatpush1.bf16.msra.mxu1 %v1083_v54  ;;  %v1051_v4 = vmax.f32 %v983_v58, 0.0  ;;  %v1169_v62 = vpop.permute.xlu0 %1168 }
 0x1f7   : > { %v989_v3 = vadd.f32 %v988_v2, %v660_v60  ;;  %v1052_v6 = vmax.f32 %v985_v61, 0.0 }
 0x1f8   : > { %v1053_v5 = vmax.f32 %v987_v1, 0.0 }
 0x1f9   : > { %v1054_v7 = vmax.f32 %v989_v3, 0.0 }
 0x1fa   : > { %v1085_v8 = vpack.c.bf16 %v1053_v5, %v1051_v4 }
 0x1fb   : > { %v1086_v9 = vpack.c.bf16 %v1054_v7, %v1052_v6 }
 0x1fd   : > { %1501 = vmatprep.subr.bf16.mxu1 %v1086_v9 }
 0x1fe   : > { %1502 = vmatpush1.bf16.msra.mxu1 %v1085_v8 }
 0x201   : > { %1504 = vmatmul.mubr.bf16.vlgmr.msra.gmra.mrb[0].mxu1 %v2889_v21 }
 0x202   : > { %1513 = vmatprep.mubr.bf16.mxu1 %v2892_v10  ;;  %v1174_v10 = vpop.permute.xlu1 %1173 }
 0x209   : > { %1514 = vmatmul.mubr.bf16.gmra.mrb[4].mxu1 %v2894_v11 }
 0x20a   : > { %1523 = vmatprep.mubr.bf16.mxu1 %v2895_v12 }
 0x211   : > { %1524 = vmatmul.mubr.bf16.gmra.mrb[8].mxu1 %v2897_v13 }
 0x212   : > { %1533 = vmatprep.mubr.bf16.mxu1 %v2898_v14 }
 0x219   : > { %1534 = vmatmul.mubr.bf16.gmra.mrb[12].mxu1 %v2900_v15  ;;  %v1179_v15 = vpop.permute.xlu0 %1178 }
 0x21a   : > { %1543 = vmatprep.mubr.bf16.mxu1 %v2901_v16 }
 0x221   : > { %1544 = vmatmul.mubr.bf16.gmra.mrb[16].mxu1 %v2903_v17 }
 0x222   : > { %1553 = vmatprep.mubr.bf16.mxu1 %v2904_v18 }
 0x229   : > { %1554 = vmatmul.mubr.bf16.gmra.mrb[20].mxu1 %v2906_v19 }
 0x22a   : > { %1563 = vmatprep.mubr.bf16.mxu1 %v2907_v20 }
 0x231   : > { %1564 = vmatmul.mubr.bf16.gmra.mrb[24].mxu1 %v2909_v22 }
 0x232   : > { %1573 = vmatprep.mubr.bf16.mxu1 %v2910_v23 }
 0x239   : > { %1574 = vmatmul.mubr.bf16.gmra.mrb[28].mxu1 %v2912_v24 }
 0x23a   : > { %1583 = vmatprep.mubr.bf16.mxu1 %v2913_v25 }
 0x241   : > { %1584 = vmatmul.mubr.bf16.gmra.mrb[32].mxu1 %v2915_v26 }
 0x242   : > { %1593 = vmatprep.mubr.bf16.mxu1 %v2916_v27  ;;  %v1184_v27 = vpop.permute.xlu1 %1183 }
 0x249   : > { %1594 = vmatmul.mubr.bf16.gmra.mrb[36].mxu1 %v2918_v28 }
 0x24a   : > { %1603 = vmatprep.mubr.bf16.mxu1 %v2919_v29 }
 0x251   : > { %1604 = vmatmul.mubr.bf16.gmra.mrb[40].mxu1 %v2921_v30 }
 0x252   : > { %1613 = vmatprep.mubr.bf16.mxu1 %v2922_v31 }
 0x259   : > { %1614 = vmatmul.mubr.bf16.gmra.mrb[44].mxu1 %v2924_v32  ;;  %v1189_v32 = vpop.permute.xlu0 %1188 }
 0x25a   : > { %1623 = vmatprep.mubr.bf16.mxu1 %v2925_v33 }
 0x261   : > { %1624 = vmatmul.mubr.bf16.gmra.mrb[48].mxu1 %v2927_v34 }
 0x262   : > { %1633 = vmatprep.mubr.bf16.mxu1 %v2928_v35 }
 0x269   : > { %1634 = vmatmul.mubr.bf16.gmra.mrb[52].mxu1 %v2930_v36 }
 0x26a   : > { %1643 = vmatprep.mubr.bf16.mxu1 %v2931_v37 }
 0x271   : > { %1644 = vmatmul.mubr.bf16.gmra.mrb[56].mxu1 %v2933_v38 }
 0x272   : > { %1653 = vmatprep.mubr.bf16.mxu1 %v2934_v39 }
 0x279   : > { %1654 = vmatmul.mubr.bf16.gmra.mrb[60].mxu1 %v2936_v40 }
 0x2d4   : > { %v1505_v42 = vpop.f32.mrb[0].mxu1 }
 0x2d5   : > { %v1506_v43 = vadd.f32 %v1505_v42, %v1154_v41  ;;  %v1507_v44 = vpop.f32.mrb[1].mxu1 }
 0x2d6   : > { %v1508_v46 = vadd.f32 %v1507_v44, %v1154_v41  ;;  %v1509_v47 = vpop.f32.mrb[2].mxu1 }
 0x2d7   : > { %v1510_v48 = vadd.f32 %v1509_v47, %v1159_v45  ;;  %v1511_v49 = vpop.f32.mrb[3].mxu1  ;;  %v1664_v52 = vmax.f32 %v1506_v43, 0.0  ;;  %v1194_v43 = vpop.permute.xlu1 %1193 }
 0x2d8   : > { %v1512_v51 = vadd.f32 %v1511_v49, %v1159_v45  ;;  %v1665_v54 = vmax.f32 %v1508_v46, 0.0 }
 0x2d9   : > { %v1666_v53 = vmax.f32 %v1510_v48, 0.0  ;;  %v1199_v48 = vpop.permute.xlu0 %1198 }
 0x2da   : > { %v1667_v55 = vmax.f32 %v1512_v51, 0.0 }
 0x2db   : > { %v1728_v56 = vpack.c.bf16 %v1666_v53, %v1664_v52 }
 0x2dc   : > { %v1729_v58 = vpack.c.bf16 %v1667_v55, %v1665_v54  ;;  %v1515_v59 = vpop.f32.mrb[4].mxu1 }
 0x2dd   : > { %v1516_v60 = vadd.f32 %v1515_v59, %v1164_v57  ;;  %v1517_v61 = vpop.f32.mrb[5].mxu1  ;;  %v1204_v59 = vpop.permute.xlu1 %1203 }
 0x2de   : > { %v1518_v1 = vadd.f32 %v1517_v61, %v1164_v57  ;;  %v1519_v2 = vpop.f32.mrb[6].mxu1  ;;  %1856 = vmatprep.subr.bf16.mxu0 %v1729_v58 }
 0x2df   : > { %v1520_v3 = vadd.f32 %v1519_v2, %v1169_v62  ;;  %v1521_v4 = vpop.f32.mrb[7].mxu1  ;;  %1857 = vmatpush1.bf16.msra.mxu0 %v1728_v56  ;;  %v1668_v6 = vmax.f32 %v1516_v60, 0.0  ;;  %v1209_v2 = vpop.permute.xlu0 %1208 }
 0x2e0   : > { %v1522_v5 = vadd.f32 %v1521_v4, %v1169_v62  ;;  %v1669_v8 = vmax.f32 %v1518_v1, 0.0 }
 0x2e1   : > { %v1670_v7 = vmax.f32 %v1520_v3, 0.0 }
 0x2e2   : > { %v1671_v9 = vmax.f32 %v1522_v5, 0.0 }
 0x2e3   : > { %v1730_v21 = vpack.c.bf16 %v1670_v7, %v1668_v6 }
 0x2e4   : > { %v1731_v11 = vpack.c.bf16 %v1671_v9, %v1669_v8  ;;  %v1525_v12 = vpop.f32.mrb[8].mxu1 }
 0x2e5   : > { %v1526_v13 = vadd.f32 %v1525_v12, %v1174_v10  ;;  %v1527_v14 = vpop.f32.mrb[9].mxu1  ;;  %v1214_v12 = vpop.permute.xlu1 %1213 }
 0x2e6   : > { %v1528_v16 = vadd.f32 %v1527_v14, %v1174_v10  ;;  %v1529_v17 = vpop.f32.mrb[10].mxu1  ;;  %1858 = vmatprep.subr.bf16.mxu0 %v1731_v11 }
 0x2e7   : > { %v1530_v18 = vadd.f32 %v1529_v17, %v1179_v15  ;;  %v1531_v19 = vpop.f32.mrb[11].mxu1  ;;  %1859 = vmatpush1.bf16.msra.mxu0 %v1730_v21  ;;  %v1672_v22 = vmax.f32 %v1526_v13, 0.0  ;;  %v1219_v17 = vpop.permute.xlu0 %1218 }
 0x2e8   : > { %v1532_v20 = vadd.f32 %v1531_v19, %v1179_v15  ;;  %v1673_v24 = vmax.f32 %v1528_v16, 0.0 }
 0x2e9   : > { %v1674_v23 = vmax.f32 %v1530_v18, 0.0 }
 0x2ea   : > { %v1675_v25 = vmax.f32 %v1532_v20, 0.0 }
 0x2eb   : > { %v1732_v26 = vpack.c.bf16 %v1674_v23, %v1672_v22 }
 0x2ec   : > { %v1733_v28 = vpack.c.bf16 %v1675_v25, %v1673_v24  ;;  %v1535_v29 = vpop.f32.mrb[12].mxu1 }
 0x2ed   : > { %v1536_v30 = vadd.f32 %v1535_v29, %v1184_v27  ;;  %v1537_v31 = vpop.f32.mrb[13].mxu1  ;;  %v1224_v29 = vpop.permute.xlu1 %1223 }
 0x2ee   : > { %v1538_v33 = vadd.f32 %v1537_v31, %v1184_v27  ;;  %v1539_v34 = vpop.f32.mrb[14].mxu1  ;;  %1860 = vmatprep.subr.bf16.mxu0 %v1733_v28 }
 0x2ef   : > { %v1540_v35 = vadd.f32 %v1539_v34, %v1189_v32  ;;  %v1541_v36 = vpop.f32.mrb[15].mxu1  ;;  %1861 = vmatpush1.bf16.msra.mxu0 %v1732_v26  ;;  %v1676_v38 = vmax.f32 %v1536_v30, 0.0  ;;  %v1229_v34 = vpop.permute.xlu0 %1228 }
 0x2f0   : > { %v1542_v37 = vadd.f32 %v1541_v36, %v1189_v32  ;;  %v1677_v40 = vmax.f32 %v1538_v33, 0.0 }
 0x2f1   : > { %v1678_v39 = vmax.f32 %v1540_v35, 0.0 }
 0x2f2   : > { %v1679_v41 = vmax.f32 %v1542_v37, 0.0 }
 0x2f3   : > { %v1734_v42 = vpack.c.bf16 %v1678_v39, %v1676_v38 }
 0x2f4   : > { %v1735_v44 = vpack.c.bf16 %v1679_v41, %v1677_v40  ;;  %v1545_v45 = vpop.f32.mrb[16].mxu1 }
 0x2f5   : > { %v1546_v46 = vadd.f32 %v1545_v45, %v1194_v43  ;;  %v1547_v47 = vpop.f32.mrb[17].mxu1  ;;  %v1234_v45 = vpop.permute.xlu1 %1233 }
 0x2f6   : > { %v1548_v49 = vadd.f32 %v1547_v47, %v1194_v43  ;;  %v1549_v50 = vpop.f32.mrb[18].mxu1  ;;  %1862 = vmatprep.subr.bf16.mxu0 %v1735_v44 }
 0x2f7   : > { %v1550_v51 = vadd.f32 %v1549_v50, %v1199_v48  ;;  %v1551_v52 = vpop.f32.mrb[19].mxu1  ;;  %1863 = vmatpush1.bf16.msra.mxu0 %v1734_v42  ;;  %v1680_v54 = vmax.f32 %v1546_v46, 0.0  ;;  %v1239_v50 = vpop.permute.xlu0 %1238 }
 0x2f8   : > { %v1552_v53 = vadd.f32 %v1551_v52, %v1199_v48  ;;  %v1681_v56 = vmax.f32 %v1548_v49, 0.0 }
 0x2f9   : > { %v1682_v55 = vmax.f32 %v1550_v51, 0.0 }
 0x2fa   : > { %v1683_v57 = vmax.f32 %v1552_v53, 0.0 }
 0x2fb   : > { %v1736_v58 = vpack.c.bf16 %v1682_v55, %v1680_v54 }
 0x2fc   : > { %v1737_v60 = vpack.c.bf16 %v1683_v57, %v1681_v56  ;;  %v1555_v61 = vpop.f32.mrb[20].mxu1 }
 0x2fd   : > { %v1556_v62 = vadd.f32 %v1555_v61, %v1204_v59  ;;  %v1557_v1 = vpop.f32.mrb[21].mxu1  ;;  %v1244_v61 = vpop.permute.xlu1 %1243 }
 0x2fe   : > { %v1558_v3 = vadd.f32 %v1557_v1, %v1204_v59  ;;  %v1559_v4 = vpop.f32.mrb[22].mxu1  ;;  %1864 = vmatprep.subr.bf16.mxu0 %v1737_v60 }
 0x2ff   : > { %v1560_v5 = vadd.f32 %v1559_v4, %v1209_v2  ;;  %v1561_v6 = vpop.f32.mrb[23].mxu1  ;;  %1865 = vmatpush1.bf16.msra.mxu0 %v1736_v58  ;;  %v1684_v8 = vmax.f32 %v1556_v62, 0.0  ;;  %v1249_v4 = vpop.permute.xlu0 %1248 }
 0x300   : > { %v1562_v7 = vadd.f32 %v1561_v6, %v1209_v2  ;;  %v1685_v21 = vmax.f32 %v1558_v3, 0.0 }
 0x301   : > { %v1686_v9 = vmax.f32 %v1560_v5, 0.0 }
 0x302   : > { %v1687_v10 = vmax.f32 %v1562_v7, 0.0 }
 0x303   : > { %v1738_v11 = vpack.c.bf16 %v1686_v9, %v1684_v8 }
 0x304   : > { %v1739_v13 = vpack.c.bf16 %v1687_v10, %v1685_v21  ;;  %v1565_v14 = vpop.f32.mrb[24].mxu1 }
 0x305   : > { %v1566_v15 = vadd.f32 %v1565_v14, %v1214_v12  ;;  %v1567_v16 = vpop.f32.mrb[25].mxu1  ;;  %v1254_v14 = vpop.permute.xlu1 %1253 }
 0x306   : > { %v1568_v18 = vadd.f32 %v1567_v16, %v1214_v12  ;;  %v1569_v19 = vpop.f32.mrb[26].mxu1  ;;  %1866 = vmatprep.subr.bf16.mxu0 %v1739_v13 }
 0x307   : > { %v1570_v20 = vadd.f32 %v1569_v19, %v1219_v17  ;;  %v1571_v22 = vpop.f32.mrb[27].mxu1  ;;  %1867 = vmatpush1.bf16.msra.mxu0 %v1738_v11  ;;  %v1688_v24 = vmax.f32 %v1566_v15, 0.0  ;;  %v1259_v19 = vpop.permute.xlu0 %1258 }
 0x308   : > { %v1572_v23 = vadd.f32 %v1571_v22, %v1219_v17  ;;  %v1689_v26 = vmax.f32 %v1568_v18, 0.0 }
 0x309   : > { %v1690_v25 = vmax.f32 %v1570_v20, 0.0 }
 0x30a   : > { %v1691_v27 = vmax.f32 %v1572_v23, 0.0 }
 0x30b   : > { %v1740_v28 = vpack.c.bf16 %v1690_v25, %v1688_v24 }
 0x30c   : > { %v1741_v30 = vpack.c.bf16 %v1691_v27, %v1689_v26  ;;  %v1575_v31 = vpop.f32.mrb[28].mxu1 }
 0x30d   : > { %v1576_v32 = vadd.f32 %v1575_v31, %v1224_v29  ;;  %v1577_v33 = vpop.f32.mrb[29].mxu1  ;;  %v1264_v31 = vpop.permute.xlu1 %1263 }
 0x30e   : > { %v1578_v35 = vadd.f32 %v1577_v33, %v1224_v29  ;;  %v1579_v36 = vpop.f32.mrb[30].mxu1  ;;  %1868 = vmatprep.subr.bf16.mxu0 %v1741_v30 }
 0x30f   : > { %v1580_v37 = vadd.f32 %v1579_v36, %v1229_v34  ;;  %v1581_v38 = vpop.f32.mrb[31].mxu1  ;;  %1869 = vmatpush1.bf16.msra.mxu0 %v1740_v28  ;;  %v1692_v40 = vmax.f32 %v1576_v32, 0.0  ;;  %v1269_v36 = vpop.permute.xlu0 %1268 }
 0x310   : > { %v1582_v39 = vadd.f32 %v1581_v38, %v1229_v34  ;;  %v1693_v42 = vmax.f32 %v1578_v35, 0.0 }
 0x311   : > { %v1694_v41 = vmax.f32 %v1580_v37, 0.0 }
 0x312   : > { %v1695_v43 = vmax.f32 %v1582_v39, 0.0 }
 0x313   : > { %v1742_v44 = vpack.c.bf16 %v1694_v41, %v1692_v40 }
 0x314   : > { %v1743_v46 = vpack.c.bf16 %v1695_v43, %v1693_v42  ;;  %v1585_v47 = vpop.f32.mrb[32].mxu1 }
 0x315   : > { %v1586_v48 = vadd.f32 %v1585_v47, %v1234_v45  ;;  %v1587_v49 = vpop.f32.mrb[33].mxu1  ;;  %v1274_v47 = vpop.permute.xlu1 %1273 }
 0x316   : > { %v1588_v51 = vadd.f32 %v1587_v49, %v1234_v45  ;;  %v1589_v52 = vpop.f32.mrb[34].mxu1  ;;  %1870 = vmatprep.subr.bf16.mxu0 %v1743_v46 }
 0x317   : > { %v1590_v53 = vadd.f32 %v1589_v52, %v1239_v50  ;;  %v1591_v54 = vpop.f32.mrb[35].mxu1  ;;  %1871 = vmatpush1.bf16.msra.mxu0 %v1742_v44  ;;  %v1696_v56 = vmax.f32 %v1586_v48, 0.0  ;;  %v1279_v52 = vpop.permute.xlu0 %1278 }
 0x318   : > { %v1592_v55 = vadd.f32 %v1591_v54, %v1239_v50  ;;  %v1697_v58 = vmax.f32 %v1588_v51, 0.0 }
 0x319   : > { %v1698_v57 = vmax.f32 %v1590_v53, 0.0 }
 0x31a   : > { %v1699_v59 = vmax.f32 %v1592_v55, 0.0 }
 0x31b   : > { %v1744_v60 = vpack.c.bf16 %v1698_v57, %v1696_v56 }
 0x31c   : > { %v1745_v62 = vpack.c.bf16 %v1699_v59, %v1697_v58  ;;  %v1595_v1 = vpop.f32.mrb[36].mxu1 }
 0x31d   : > { %v1596_v2 = vadd.f32 %v1595_v1, %v1244_v61  ;;  %v1597_v3 = vpop.f32.mrb[37].mxu1  ;;  %v1284_v1 = vpop.permute.xlu1 %1283 }
 0x31e   : > { %v1598_v5 = vadd.f32 %v1597_v3, %v1244_v61  ;;  %v1599_v6 = vpop.f32.mrb[38].mxu1  ;;  %1872 = vmatprep.subr.bf16.mxu0 %v1745_v62 }
 0x31f   : > { %v1600_v7 = vadd.f32 %v1599_v6, %v1249_v4  ;;  %v1601_v8 = vpop.f32.mrb[39].mxu1  ;;  %1873 = vmatpush1.bf16.msra.mxu0 %v1744_v60  ;;  %v1700_v21 = vmax.f32 %v1596_v2, 0.0  ;;  %v1289_v6 = vpop.permute.xlu0 %1288 }
 0x320   : > { %v1602_v9 = vadd.f32 %v1601_v8, %v1249_v4  ;;  %v1701_v11 = vmax.f32 %v1598_v5, 0.0 }
 0x321   : > { %v1702_v10 = vmax.f32 %v1600_v7, 0.0 }
 0x322   : > { %v1703_v12 = vmax.f32 %v1602_v9, 0.0 }
 0x323   : > { %v1746_v13 = vpack.c.bf16 %v1702_v10, %v1700_v21 }
 0x324   : > { %v1747_v15 = vpack.c.bf16 %v1703_v12, %v1701_v11  ;;  %v1605_v16 = vpop.f32.mrb[40].mxu1 }
 0x325   : > { %v1606_v17 = vadd.f32 %v1605_v16, %v1254_v14  ;;  %v1607_v18 = vpop.f32.mrb[41].mxu1  ;;  %v1294_v16 = vpop.permute.xlu1 %1293 }
 0x326   : > { %v1608_v20 = vadd.f32 %v1607_v18, %v1254_v14  ;;  %v1609_v22 = vpop.f32.mrb[42].mxu1  ;;  %1874 = vmatprep.subr.bf16.mxu0 %v1747_v15 }
 0x327   : > { %v1610_v23 = vadd.f32 %v1609_v22, %v1259_v19  ;;  %v1611_v24 = vpop.f32.mrb[43].mxu1  ;;  %1875 = vmatpush1.bf16.msra.mxu0 %v1746_v13  ;;  %v1704_v26 = vmax.f32 %v1606_v17, 0.0  ;;  %v1299_v22 = vpop.permute.xlu0 %1298 }
 0x328   : > { %v1612_v25 = vadd.f32 %v1611_v24, %v1259_v19  ;;  %v1705_v28 = vmax.f32 %v1608_v20, 0.0 }
 0x329   : > { %v1706_v27 = vmax.f32 %v1610_v23, 0.0 }
 0x32a   : > { %v1707_v29 = vmax.f32 %v1612_v25, 0.0 }
 0x32b   : > { %v1748_v30 = vpack.c.bf16 %v1706_v27, %v1704_v26 }
 0x32c   : > { %v1749_v32 = vpack.c.bf16 %v1707_v29, %v1705_v28  ;;  %v1615_v33 = vpop.f32.mrb[44].mxu1 }
 0x32d   : > { %v1616_v34 = vadd.f32 %v1615_v33, %v1264_v31  ;;  %v1617_v35 = vpop.f32.mrb[45].mxu1  ;;  %v1304_v33 = vpop.permute.xlu1 %1303 }
 0x32e   : > { %v1618_v37 = vadd.f32 %v1617_v35, %v1264_v31  ;;  %v1619_v38 = vpop.f32.mrb[46].mxu1  ;;  %1876 = vmatprep.subr.bf16.mxu0 %v1749_v32 }
 0x32f   : > { %v1620_v39 = vadd.f32 %v1619_v38, %v1269_v36  ;;  %v1621_v40 = vpop.f32.mrb[47].mxu1  ;;  %1877 = vmatpush1.bf16.msra.mxu0 %v1748_v30  ;;  %v1708_v42 = vmax.f32 %v1616_v34, 0.0  ;;  %v1309_v38 = vpop.permute.xlu0 %1308 }
 0x330   : > { %v1622_v41 = vadd.f32 %v1621_v40, %v1269_v36  ;;  %v1709_v44 = vmax.f32 %v1618_v37, 0.0 }
 0x331   : > { %v1710_v43 = vmax.f32 %v1620_v39, 0.0 }
 0x332   : > { %v1711_v45 = vmax.f32 %v1622_v41, 0.0 }
 0x333   : > { %v1750_v46 = vpack.c.bf16 %v1710_v43, %v1708_v42 }
 0x334   : > { %v1751_v48 = vpack.c.bf16 %v1711_v45, %v1709_v44  ;;  %v1625_v49 = vpop.f32.mrb[48].mxu1 }
 0x335   : > { %v1626_v50 = vadd.f32 %v1625_v49, %v1274_v47  ;;  %v1627_v51 = vpop.f32.mrb[49].mxu1 }
 0x336   : > { %v1628_v53 = vadd.f32 %v1627_v51, %v1274_v47  ;;  %v1629_v54 = vpop.f32.mrb[50].mxu1  ;;  %1878 = vmatprep.subr.bf16.mxu0 %v1751_v48  ;;  %v2940_v51 = vld [vmem:[%s4032_s5 + $0x14] ss:$8 sps:$4 sm:$0xff]  }
 0x337   : > { %v1630_v55 = vadd.f32 %v1629_v54, %v1279_v52  ;;  %v1631_v56 = vpop.f32.mrb[51].mxu1  ;;  %1879 = vmatpush1.bf16.msra.mxu0 %v1750_v46  ;;  %v1712_v58 = vmax.f32 %v1626_v50, 0.0  ;;  %v2937_v50 = vld [vmem:[%s4032_s5] ss:$8 sps:$4 sm:$0xff]  }
 0x338   : > { %v1632_v57 = vadd.f32 %v1631_v56, %v1279_v52  ;;  %v1713_v60 = vmax.f32 %v1628_v53, 0.0  ;;  %v2942_v52 = vld [vmem:[%s4032_s5 + $0x10] ss:$8 sps:$4 sm:$0xff]   ;;  %v2943_v53 = vld [vmem:[%s4032_s5 + $0x24] ss:$8 sps:$4 sm:$0xff]  }
 0x339   : > { %v1714_v59 = vmax.f32 %v1630_v55, 0.0  ;;  %v2945_v54 = vld [vmem:[%s4032_s5 + $0x20] ss:$8 sps:$4 sm:$0xff]   ;;  %v2946_v55 = vld [vmem:[%s4032_s5 + $0x34] ss:$8 sps:$4 sm:$0xff]  }
 0x33a   : > { %v1715_v61 = vmax.f32 %v1632_v57, 0.0  ;;  %v2948_v56 = vld [vmem:[%s4032_s5 + $0x30] ss:$8 sps:$4 sm:$0xff]   ;;  %v1779_v57 = vpop.permute.xlu1 %1778 }
 0x33b   : > { %v1752_v62 = vpack.c.bf16 %v1714_v59, %v1712_v58 }
 0x33c   : > { %v1753_v2 = vpack.c.bf16 %v1715_v61, %v1713_v60  ;;  %v1635_v3 = vpop.f32.mrb[52].mxu1 }
 0x33d   : > { %v1636_v4 = vadd.f32 %v1635_v3, %v1284_v1  ;;  %v1637_v5 = vpop.f32.mrb[53].mxu1 }
 0x33e   : > { %v1638_v7 = vadd.f32 %v1637_v5, %v1284_v1  ;;  %v1639_v8 = vpop.f32.mrb[54].mxu1  ;;  %1880 = vmatprep.subr.bf16.mxu0 %v1753_v2  ;;  %v1789_v2 = vpop.permute.xlu0 %1788 }
 0x33f   : > { %v1640_v9 = vadd.f32 %v1639_v8, %v1289_v6  ;;  %v1641_v21 = vpop.f32.mrb[55].mxu1  ;;  %1881 = vmatpush1.bf16.msra.mxu0 %v1752_v62  ;;  %v1716_v11 = vmax.f32 %v1636_v4, 0.0 }
 0x340   : > { %v1642_v10 = vadd.f32 %v1641_v21, %v1289_v6  ;;  %v1717_v13 = vmax.f32 %v1638_v7, 0.0 }
 0x341   : > { %v1718_v12 = vmax.f32 %v1640_v9, 0.0 }
 0x342   : > { %v1719_v14 = vmax.f32 %v1642_v10, 0.0 }
 0x343   : > { %v1754_v15 = vpack.c.bf16 %v1718_v12, %v1716_v11  ;;  %v1799_v12 = vpop.permute.xlu1 %1798 }
 0x344   : > { %v1755_v17 = vpack.c.bf16 %v1719_v14, %v1717_v13  ;;  %v1645_v18 = vpop.f32.mrb[56].mxu1 }
 0x345   : > { %v1646_v19 = vadd.f32 %v1645_v18, %v1294_v16  ;;  %v1647_v20 = vpop.f32.mrb[57].mxu1 }
 0x346   : > { %v1648_v23 = vadd.f32 %v1647_v20, %v1294_v16  ;;  %v1649_v24 = vpop.f32.mrb[58].mxu1  ;;  %1882 = vmatprep.subr.bf16.mxu0 %v1755_v17 }
 0x347   : > { %v1650_v25 = vadd.f32 %v1649_v24, %v1299_v22  ;;  %v1651_v26 = vpop.f32.mrb[59].mxu1  ;;  %1883 = vmatpush1.bf16.msra.mxu0 %v1754_v15  ;;  %v1720_v28 = vmax.f32 %v1646_v19, 0.0 }
 0x348   : > { %v1652_v27 = vadd.f32 %v1651_v26, %v1299_v22  ;;  %v1721_v30 = vmax.f32 %v1648_v23, 0.0  ;;  %v1809_v26 = vpop.permute.xlu0 %1808 }
 0x349   : > { %v1722_v29 = vmax.f32 %v1650_v25, 0.0 }
 0x34a   : > { %v1723_v31 = vmax.f32 %v1652_v27, 0.0 }
 0x34b   : > { %v1756_v32 = vpack.c.bf16 %v1722_v29, %v1720_v28 }
 0x34c   : > { %v1757_v34 = vpack.c.bf16 %v1723_v31, %v1721_v30  ;;  %v1655_v35 = vpop.f32.mrb[60].mxu1  ;;  %v1784_v31 = vpop.permute.xlu1 %1783 }
 0x34d   : > { %v1656_v36 = vadd.f32 %v1655_v35, %v1304_v33  ;;  %v1657_v37 = vpop.f32.mrb[61].mxu1 }
 0x34e   : > { %v1658_v39 = vadd.f32 %v1657_v37, %v1304_v33  ;;  %v1659_v40 = vpop.f32.mrb[62].mxu1  ;;  %1884 = vmatprep.subr.bf16.mxu0 %v1757_v34 }
 0x34f   : > { %v1660_v41 = vadd.f32 %v1659_v40, %v1309_v38  ;;  %v1661_v42 = vpop.f32.mrb[63].mxu1  ;;  %1885 = vmatpush1.bf16.msra.mxu0 %v1756_v32  ;;  %v1724_v44 = vmax.f32 %v1656_v36, 0.0 }
 0x350   : > { %v1662_v43 = vadd.f32 %v1661_v42, %v1309_v38  ;;  %v1725_v46 = vmax.f32 %v1658_v39, 0.0 }
 0x351   : > { %v1726_v45 = vmax.f32 %v1660_v41, 0.0 }
 0x352   : > { %v1727_v47 = vmax.f32 %v1662_v43, 0.0 }
 0x353   : > { %v1758_v48 = vpack.c.bf16 %v1726_v45, %v1724_v44 }
 0x354   : > { %v1759_v49 = vpack.c.bf16 %v1727_v47, %v1725_v46 }
 0x356   : > { %1886 = vmatprep.subr.bf16.mxu0 %v1759_v49  ;;  %v1794_v49 = vpop.permute.xlu0 %1793 }
 0x357   : > { %1887 = vmatpush1.bf16.msra.mxu0 %v1758_v48 }
 0x35a   : > { %1889 = vmatmul.mubr.bf16.vlgmr.msra.gmra.mrb[64].mxu0 %v2937_v50 }
 0x35b   : > { %1898 = vmatprep.mubr.bf16.mxu0 %v2940_v51 }
 0x362   : > { %1899 = vmatmul.mubr.bf16.gmra.mrb[68].mxu0 %v2942_v52 }
 0x363   : > { %1908 = vmatprep.mubr.bf16.mxu0 %v2943_v53 }
 0x36a   : > { %1909 = vmatmul.mubr.bf16.gmra.mrb[72].mxu0 %v2945_v54 }
 0x36b   : > { %1918 = vmatprep.mubr.bf16.mxu0 %v2946_v55 }
 0x372   : > { %1919 = vmatmul.mubr.bf16.gmra.mrb[76].mxu0 %v2948_v56 }
 0x42d   : > { %v1890_v58 = vpop.f32.mrb[64].mxu0 }
 0x42e   : > { %v1891_v59 = vadd.f32 %v1890_v58, %v1779_v57  ;;  %v1892_v60 = vpop.f32.mrb[65].mxu0 }
 0x42f   : > { %v1893_v61 = vadd.f32 %v1892_v60, %v1779_v57  ;;  %v1894_v62 = vpop.f32.mrb[66].mxu0 }
 0x430   : > { %2949 = vtanh.f32 %v1891_v59  ;;  %v1896_v1 = vpop.f32.mrb[67].mxu0  ;;  %v1895_v35 = vadd.f32 %v1894_v62, %v1784_v31 }
 0x431   : > { %2951 = vtanh.f32 %v1893_v61  ;;  %v1897_v38 = vadd.f32 %v1896_v1, %v1784_v31 }
 0x435   : > { %v1900_v3 = vpop.f32.mrb[68].mxu0 }
 0x436   : > { %v1901_v4 = vadd.f32 %v1900_v3, %v1789_v2  ;;  %v1902_v5 = vpop.f32.mrb[69].mxu0 }
 0x437   : > { %v1903_v6 = vadd.f32 %v1902_v5, %v1789_v2  ;;  %v1904_v7 = vpop.f32.mrb[70].mxu0  ;;  %v1804_v2 = vpop.permute.xlu1 %1803 }
 0x438   : > { %2953 = vtanh.f32 %v1901_v4  ;;  %v1906_v8 = vpop.f32.mrb[71].mxu0  ;;  %v1905_v50 = vadd.f32 %v1904_v7, %v1794_v49  ;;  %v3110_v4 = vmov 1966171168  }
 0x439   : > { %2955 = vtanh.f32 %v1903_v6  ;;  %v1907_v52 = vadd.f32 %v1906_v8, %v1794_v49  ;;  %v2250_v5 = vunpack.c.l.s4 %v3110_v4 }
 0x43a   : > { %v2950_v9 = vpop.eup %2949 }
 0x43b   : > { %v2952_v21 = vpop.eup %2951  ;;  %v1931_v10 = vmul.f32 1.442695, %v2950_v9 }
 0x43c   : > { %v1933_v11 = vmul.f32 1.442695, %v2952_v21 }
 0x43d   : > { %2957 = vpow2.f32 %v1931_v10  ;;  %v1910_v13 = vpop.f32.mrb[72].mxu0 }
 0x43e   : > { %2959 = vpow2.f32 %v1933_v11  ;;  %v1911_v14 = vadd.f32 %v1910_v13, %v1799_v12  ;;  %v1912_v15 = vpop.f32.mrb[73].mxu0 }
 0x43f   : > { %v1913_v16 = vadd.f32 %v1912_v15, %v1799_v12  ;;  %v3740_v17 = vpop.f32.mrb[74].mxu0 }
 0x440   : > { %2961 = vtanh.f32 %v1911_v14  ;;  %v3742_v18 = vpop.f32.mrb[75].mxu0  ;;  %v1915_v7 = vadd.f32 %v3740_v17, %v1804_v2 }
 0x441   : > { %2963 = vtanh.f32 %v1913_v16  ;;  %v1917_v10 = vadd.f32 %v3742_v18, %v1804_v2 }
 0x442   : > { %v2954_v19 = vpop.eup %2953 }
 0x443   : > { %v2956_v20 = vpop.eup %2955  ;;  %v1943_v22 = vmul.f32 1.442695, %v2954_v19  ;;  %v1951_v23 = vadd.f32 %v2954_v19, %v2950_v9 }
 0x444   : > { %v1945_v24 = vmul.f32 1.442695, %v2956_v20  ;;  %v1952_v25 = vadd.f32 %v2956_v20, %v2952_v21  ;;  %v2252_v21 = vlaneseq  ;;  %v2251_v20 = vunpack.c.0.s8 %v2250_v5 }
 0x445   : > { %2965 = vpow2.f32 %v1943_v22  ;;  %v1920_v27 = vpop.f32.mrb[76].mxu0 }
 0x446   : > { %2967 = vpow2.f32 %v1945_v24  ;;  %v1921_v28 = vadd.f32 %v1920_v27, %v1809_v26  ;;  %v1922_v29 = vpop.f32.mrb[77].mxu0  ;;  %v2253_v22 = vshrl.u32 %v2252_v21, 7  ;;  %vm2266_vm2 = vcmp.lt.s32.totalorder %v2252_v21, 256 }
 0x447   : > { %v2958_v30 = vpop.eup %2957  ;;  %v1923_v32 = vadd.f32 %v1922_v29, %v1809_v26  ;;  %v3744_v33 = vpop.f32.mrb[78].mxu0 }
 0x448   : > { %v2960_v34 = vpop.eup %2959  ;;  %v1935_v36 = vmul.f32 %v2958_v30, %v3618_v0  ;;  %2969 = vtanh.f32 %v1921_v28  ;;  %v3747_v37 = vpop.f32.mrb[79].mxu0  ;;  %v2254_v29 = vsub.s32 %v2251_v20, %v2253_v22 }
 0x449   : > { %v1936_v39 = vmul.f32 %v2960_v34, %v3616_v63  ;;  %2971 = vtanh.f32 %v1923_v32  ;;  %v1814_v26 = vpop.permute.xlu0 %1813 }
 0x44a   : > { %v2962_v40 = vpop.eup %2961  ;;  %v1937_v41 = vadd.f32 %v1935_v36, %v1895_v35  ;;  %v1925_v18 = vadd.f32 %v3744_v33, %v1814_v26  ;;  %v1927_v31 = vadd.f32 %v3747_v37, %v1814_v26 }
 0x44b   : > { %v2964_v42 = vpop.eup %2963  ;;  %v1938_v43 = vadd.f32 %v1936_v39, %v1897_v38  ;;  %v1955_v44 = vmul.f32 1.442695, %v2962_v40  ;;  %v1963_v45 = vadd.f32 %v2962_v40, %v1951_v23 }
 0x44c   : > { %v1957_v46 = vmul.f32 1.442695, %v2964_v42  ;;  %v1964_v47 = vadd.f32 %v2964_v42, %v1952_v25 }
 0x44d   : > { %2973 = vpow2.f32 %v1955_v44 }
 0x44e   : > { %2975 = vpow2.f32 %v1957_v46 }
 0x44f   : > { %v2966_v48 = vpop.eup %2965 }
 0x450   : > { %v2968_v0 = vpop.eup %2967  ;;  %v1947_v51 = vmul.f32 %v2966_v48, %v1937_v41 }
 0x451   : > { %v1948_v53 = vmul.f32 %v2968_v0, %v1938_v43 }
 0x452   : > { %v2970_v54 = vpop.eup %2969  ;;  %v1949_v63 = vadd.f32 %v1947_v51, %v1905_v50 }
 0x453   : > { %v2972_v55 = vpop.eup %2971  ;;  %v1950_v56 = vadd.f32 %v1948_v53, %v1907_v52  ;;  %v1967_v57 = vmul.f32 1.442695, %v2970_v54  ;;  %v1975_v58 = vadd.f32 %v2970_v54, %v1963_v45 }
 0x454   : > { %v1969_v59 = vmul.f32 1.442695, %v2972_v55  ;;  %v1976_v60 = vadd.f32 %v2972_v55, %v1964_v47 }
 0x455   : > { %2977 = vpow2.f32 %v1967_v57  ;;  %v2234_v61 = vrot.slane %v1975_v58, 4 }
 0x456   : > { %2979 = vpow2.f32 %v1969_v59  ;;  %v2240_v62 = vrot.slane %v1976_v60, 4 }
 0x457   : > { %v2974_v1 = vpop.eup %2973  ;;  %v2235_v3 = vadd.f32 %v2234_v61, %v1975_v58 }
 0x458   : > { %v2976_v6 = vpop.eup %2975  ;;  %v1959_v8 = vmul.f32 %v2974_v1, %v1949_v63  ;;  %v2241_v9 = vadd.f32 %v2240_v62, %v1976_v60 }
 0x459   : > { %v1960_v11 = vmul.f32 %v2976_v6, %v1950_v56  ;;  %v2236_v12 = vrot.slane %v2235_v3, 2 }
 0x45a   : > { %v1961_v13 = vadd.f32 %v1959_v8, %v1915_v7  ;;  %v2242_v14 = vrot.slane %v2241_v9, 2 }
 0x45b   : > { %v1962_v15 = vadd.f32 %v1960_v11, %v1917_v10  ;;  %v2237_v16 = vadd.f32 %v2236_v12, %v2235_v3 }
 0x45c   : > { %v2243_v19 = vadd.f32 %v2242_v14, %v2241_v9 }
 0x45d   : > { %v2238_v23 = vrot.slane %v2237_v16, 1 }
 0x45e   : > { %v2244_v24 = vrot.slane %v2243_v19, 1 }
 0x45f   : > { %v2978_v25 = vpop.eup %2977  ;;  %v2239_v17 = vadd.f32 %v2238_v23, %v2237_v16 }
 0x460   : > { %v2980_v27 = vpop.eup %2979  ;;  %v2245_v28 = vadd.f32 %v2244_v24, %v2243_v19  ;;  %v1971_v30 = vmul.f32 %v2978_v25, %v1961_v13 }
 0x461   : > { %v1972_v32 = vmul.f32 %v2980_v27, %v1962_v15 }
 0x462   : > { %v2248_v34 = vcombine.low %v2239_v17, %v2245_v28  ;;  %v1973_v35 = vadd.f32 %v1971_v30, %v1925_v18 }
 0x463   : > { %v1974_v36 = vadd.f32 %v1972_v32, %v1927_v31 }
 0x464   : > { %v2255_v38 = vrot.slane %v2248_v34, %v2254_v29  ;;  %2009 = vxpose.xlu1.b32.start.end [1/1] (short) %v1973_v35, 128 }
 0x465   : > { %2041 = vxpose.xlu0.b32.start.end [1/1] (short) %v1974_v36, 128 }
 0x466   : > { %v2262_v39 = vrot.slane %v2255_v38, %v2254_v29 }
 0x468   : > { %2268 = vst.msk [vmem:[%s3755_s22] sm:$0x3] %vm2266_vm2, %v2262_v39 }
 0x4e4   : > { %v2025_v40 = vpop.trf.xlu1 }
 0x4e5   : > { %v2057_v41 = vpop.trf.xlu0  ;;  %2105 = vrot.lane.b32.xlu0 %v2025_v40, %s3111_s23 }
 0x4e6   : > { %2137 = vrot.lane.b32.xlu1 %v2057_v41, %s3111_s23 }
 0x4e8   : > { %v2026_v33 = vpop.trf.xlu1 }
 0x4e9   : > { %v2058_v37 = vpop.trf.xlu0 }
 0x4ea   : > { %2107 = vrot.lane.b32.xlu1 %v2026_v33, %s3111_s23  ;;  %2139 = vrot.lane.b32.xlu0 %v2058_v37, %s3111_s23 }
 0x4ec   : > { %v2027_v42 = vpop.trf.xlu1 }
 0x4ed   : > { %v2059_v43 = vpop.trf.xlu0 }
 0x4ee   : > { %2109 = vrot.lane.b32.xlu1 %v2027_v42, %s3111_s23 }
 0x4f0   : > { %v2028_v44 = vpop.trf.xlu1 }
 0x4f1   : > { %2111 = vrot.lane.b32.xlu0 %v2028_v44, %s3111_s23  ;;  %v2060_v45 = vpop.trf.xlu0 }
 0x4f2   : > { %2141 = vrot.lane.b32.xlu1 %v2059_v43, %s3111_s23 }
 0x4f4   : > { %v2029_v46 = vpop.trf.xlu1 }
 0x4f5   : > { %2143 = vrot.lane.b32.xlu0 %v2060_v45, %s3111_s23  ;;  %v2061_v47 = vpop.trf.xlu0 }
 0x4f6   : > { %2113 = vrot.lane.b32.xlu1 %v2029_v46, %s3111_s23 }
 0x4f8   : > { %v2030_v48 = vpop.trf.xlu1 }
 0x4f9   : > { %2115 = vrot.lane.b32.xlu0 %v2030_v48, %s3111_s23  ;;  %v2062_v49 = vpop.trf.xlu0 }
 0x4fa   : > { %2145 = vrot.lane.b32.xlu1 %v2061_v47, %s3111_s23 }
 0x4fc   : > { %v2031_v0 = vpop.trf.xlu1 }
 0x4fd   : > { %2147 = vrot.lane.b32.xlu0 %v2062_v49, %s3111_s23  ;;  %v2063_v50 = vpop.trf.xlu0 }
 0x4fe   : > { %2117 = vrot.lane.b32.xlu1 %v2031_v0, %s3111_s23 }
 0x500   : > { %v2032_v51 = vpop.trf.xlu1 }
 0x501   : > { %2119 = vrot.lane.b32.xlu0 %v2032_v51, %s3111_s23  ;;  %v2064_v52 = vpop.trf.xlu0 }
 0x502   : > { %2149 = vrot.lane.b32.xlu1 %v2063_v50, %s3111_s23 }
 0x504   : > { %v2033_v53 = vpop.trf.xlu1 }
 0x505   : > { %2151 = vrot.lane.b32.xlu0 %v2064_v52, %s3111_s23  ;;  %v2065_v54 = vpop.trf.xlu0 }
 0x506   : > { %2121 = vrot.lane.b32.xlu1 %v2033_v53, %s3111_s23 }
 0x508   : > { %v2034_v63 = vpop.trf.xlu1 }
 0x509   : > { %2123 = vrot.lane.b32.xlu0 %v2034_v63, %s3111_s23  ;;  %v2066_v55 = vpop.trf.xlu0 }
 0x50a   : > { %2153 = vrot.lane.b32.xlu1 %v2065_v54, %s3111_s23 }
 0x50c   : > { %v2035_v56 = vpop.trf.xlu1 }
 0x50d   : > { %2155 = vrot.lane.b32.xlu0 %v2066_v55, %s3111_s23  ;;  %v2067_v57 = vpop.trf.xlu0 }
 0x50e   : > { %2125 = vrot.lane.b32.xlu1 %v2035_v56, %s3111_s23 }
 0x510   : > { %v2036_v58 = vpop.trf.xlu1 }
 0x511   : > { %2127 = vrot.lane.b32.xlu0 %v2036_v58, %s3111_s23  ;;  %v2068_v59 = vpop.trf.xlu0 }
 0x512   : > { %2157 = vrot.lane.b32.xlu1 %v2067_v57, %s3111_s23 }
 0x514   : > { %v2037_v60 = vpop.trf.xlu1 }
 0x515   : > { %2159 = vrot.lane.b32.xlu0 %v2068_v59, %s3111_s23  ;;  %v2069_v61 = vpop.trf.xlu0 }
 0x516   : > { %2129 = vrot.lane.b32.xlu1 %v2037_v60, %s3111_s23 }
 0x518   : > { %v2038_v62 = vpop.trf.xlu1 }
 0x519   : > { %2131 = vrot.lane.b32.xlu0 %v2038_v62, %s3111_s23  ;;  %v2070_v1 = vpop.trf.xlu0 }
 0x51a   : > { %2161 = vrot.lane.b32.xlu1 %v2069_v61, %s3111_s23 }
 0x51c   : > { %v2039_v2 = vpop.trf.xlu1 }
 0x51d   : > { %2163 = vrot.lane.b32.xlu0 %v2070_v1, %s3111_s23  ;;  %v2071_v3 = vpop.trf.xlu0 }
 0x51e   : > { %2133 = vrot.lane.b32.xlu1 %v2039_v2, %s3111_s23 }
 0x520   : > { %v2040_v4 = vpop.trf.xlu1 }
 0x521   : > { %2135 = vrot.lane.b32.xlu0 %v2040_v4, %s3111_s23  ;;  %v2072_v5 = vpop.trf.xlu0 }
 0x522   : > { %2165 = vrot.lane.b32.xlu1 %v2071_v3, %s3111_s23 }
 0x525   : > { %2167 = vrot.lane.b32.xlu0 %v2072_v5, %s3111_s23 }
 0x557   : > { %v2106_v6 = vpop.permute.xlu0 %2105 }
 0x558   : > { %2202 = vst.msk [vmem:[%s3223_s25] sm:$0xff] %vm2201_vm3, %v2106_v6  ;;  %v2138_v7 = vpop.permute.xlu1 %2137 }
 0x559   : > { %2218 = vst.msk [vmem:[%s3223_s25 + $0x80] sm:$0xff] %vm2201_vm3, %v2138_v7 }
 0x55c   : > { %v2108_v8 = vpop.permute.xlu1 %2107  ;;  %v2140_v9 = vpop.permute.xlu0 %2139 }
 0x55d   : > { %2203 = vst.msk [vmem:[%s3223_s25 + $0x8] sm:$0xff] %vm2201_vm3, %v2108_v8  ;;  %2219 = vst.msk [vmem:[%s3223_s25 + $0x88] sm:$0xff] %vm2201_vm3, %v2140_v9 }
 0x560   : > { %v2110_v21 = vpop.permute.xlu1 %2109 }
 0x561   : > { %2204 = vst.msk [vmem:[%s3223_s25 + $0x10] sm:$0xff] %vm2201_vm3, %v2110_v21 }
 0x563   : > { %v2112_v10 = vpop.permute.xlu0 %2111 }
 0x564   : > { %2205 = vst.msk [vmem:[%s3223_s25 + $0x18] sm:$0xff] %vm2201_vm3, %v2112_v10  ;;  %v2142_v11 = vpop.permute.xlu1 %2141 }
 0x565   : > { %2220 = vst.msk [vmem:[%s3223_s25 + $0x90] sm:$0xff] %vm2201_vm3, %v2142_v11 }
 0x567   : > { %v2144_v12 = vpop.permute.xlu0 %2143 }
 0x568   : > { %2221 = vst.msk [vmem:[%s3223_s25 + $0x98] sm:$0xff] %vm2201_vm3, %v2144_v12  ;;  %v2114_v13 = vpop.permute.xlu1 %2113 }
 0x569   : > { %2206 = vst.msk [vmem:[%s3223_s25 + $0x20] sm:$0xff] %vm2201_vm3, %v2114_v13 }
 0x56b   : > { %v2116_v14 = vpop.permute.xlu0 %2115 }
 0x56c   : > { %2207 = vst.msk [vmem:[%s3223_s25 + $0x28] sm:$0xff] %vm2201_vm3, %v2116_v14  ;;  %v2146_v15 = vpop.permute.xlu1 %2145 }
 0x56d   : > { %2222 = vst.msk [vmem:[%s3223_s25 + $0xa0] sm:$0xff] %vm2201_vm3, %v2146_v15 }
 0x56f   : > { %v2148_v16 = vpop.permute.xlu0 %2147 }
 0x570   : > { %2223 = vst.msk [vmem:[%s3223_s25 + $0xa8] sm:$0xff] %vm2201_vm3, %v2148_v16  ;;  %v2118_v19 = vpop.permute.xlu1 %2117 }
 0x571   : > { %2208 = vst.msk [vmem:[%s3223_s25 + $0x30] sm:$0xff] %vm2201_vm3, %v2118_v19 }
 0x573   : > { %v2120_v20 = vpop.permute.xlu0 %2119 }
 0x574   : > { %2209 = vst.msk [vmem:[%s3223_s25 + $0x38] sm:$0xff] %vm2201_vm3, %v2120_v20  ;;  %v2150_v22 = vpop.permute.xlu1 %2149 }
 0x575   : > { %2224 = vst.msk [vmem:[%s3223_s25 + $0xb0] sm:$0xff] %vm2201_vm3, %v2150_v22 }
 0x577   : > { %v2152_v23 = vpop.permute.xlu0 %2151 }
 0x578   : > { %2225 = vst.msk [vmem:[%s3223_s25 + $0xb8] sm:$0xff] %vm2201_vm3, %v2152_v23  ;;  %v2122_v24 = vpop.permute.xlu1 %2121 }
 0x579   : > { %2210 = vst.msk [vmem:[%s3223_s25 + $0x40] sm:$0xff] %vm2201_vm3, %v2122_v24 }
 0x57b   : > { %v2124_v25 = vpop.permute.xlu0 %2123 }
 0x57c   : > { %2211 = vst.msk [vmem:[%s3223_s25 + $0x48] sm:$0xff] %vm2201_vm3, %v2124_v25  ;;  %v2154_v26 = vpop.permute.xlu1 %2153 }
 0x57d   : > { %2226 = vst.msk [vmem:[%s3223_s25 + $0xc0] sm:$0xff] %vm2201_vm3, %v2154_v26 }
 0x57f   : > { %v2156_v17 = vpop.permute.xlu0 %2155 }
 0x580   : > { %2227 = vst.msk [vmem:[%s3223_s25 + $0xc8] sm:$0xff] %vm2201_vm3, %v2156_v17  ;;  %v2126_v27 = vpop.permute.xlu1 %2125 }
 0x581   : > { %2212 = vst.msk [vmem:[%s3223_s25 + $0x50] sm:$0xff] %vm2201_vm3, %v2126_v27 }
 0x583   : > { %v2128_v28 = vpop.permute.xlu0 %2127 }
 0x584   : > { %2213 = vst.msk [vmem:[%s3223_s25 + $0x58] sm:$0xff] %vm2201_vm3, %v2128_v28  ;;  %v2158_v29 = vpop.permute.xlu1 %2157 }
 0x585   : > { %2228 = vst.msk [vmem:[%s3223_s25 + $0xd0] sm:$0xff] %vm2201_vm3, %v2158_v29 }
 0x587   : > { %v2160_v18 = vpop.permute.xlu0 %2159 }
 0x588   : > { %2229 = vst.msk [vmem:[%s3223_s25 + $0xd8] sm:$0xff] %vm2201_vm3, %v2160_v18  ;;  %v2130_v30 = vpop.permute.xlu1 %2129 }
 0x589   : > { %2214 = vst.msk [vmem:[%s3223_s25 + $0x60] sm:$0xff] %vm2201_vm3, %v2130_v30 }
 0x58b   : > { %v2132_v31 = vpop.permute.xlu0 %2131 }
 0x58c   : > { %2215 = vst.msk [vmem:[%s3223_s25 + $0x68] sm:$0xff] %vm2201_vm3, %v2132_v31  ;;  %v2162_v32 = vpop.permute.xlu1 %2161 }
 0x58d   : > { %2230 = vst.msk [vmem:[%s3223_s25 + $0xe0] sm:$0xff] %vm2201_vm3, %v2162_v32 }
 0x58f   : > { %v2164_v34 = vpop.permute.xlu0 %2163 }
 0x590   : > { %2231 = vst.msk [vmem:[%s3223_s25 + $0xe8] sm:$0xff] %vm2201_vm3, %v2164_v34  ;;  %v2134_v35 = vpop.permute.xlu1 %2133 }
 0x591   : > { %2216 = vst.msk [vmem:[%s3223_s25 + $0x70] sm:$0xff] %vm2201_vm3, %v2134_v35 }
 0x592   : > { %2280 = sbr.rel (!%p3196_p5) target bundleno = 1489 (0x5d1), region = 52 }
 0x593   : > { %v2136_v36 = vpop.permute.xlu0 %2135 }
 0x594   : > { %2217 = vst.msk [vmem:[%s3223_s25 + $0x78] sm:$0xff] %vm2201_vm3, %v2136_v36  ;;  %v2166_v38 = vpop.permute.xlu1 %2165 }
 0x595   : > { %2232 = vst.msk [vmem:[%s3223_s25 + $0xf0] sm:$0xff] %vm2201_vm3, %v2166_v38 }
 0x597   : > { %v2168_v39 = vpop.permute.xlu0 %2167 }
 0x598   : > { %2233 = vst.msk [vmem:[%s3223_s25 + $0xf8] sm:$0xff] %vm2201_vm3, %v2168_v39 }
 0x599   : > { %s4059_s26 = smov (!%p2283_p11, %s2282_s26), 32 }
 0x59a   : > { %s2743_s20 = sshll.u32 %s4059_s26, 7 }
 0x59b   : > { %p2746_p12 = scmp.eq.s32.totalorder %s2743_s20, 0 }
 0x59c   : > { %s3868_s21 = sshrl.u32 (!%p2746_p12), %s4059_s26, 5 }
 0x59d   : > { %2291 = sbr.rel (%p2746_p12) target bundleno = 1489 (0x5d1), region = 56  ;;  %p2747_p13 = scmp.le.s32.totalorder (!%p2746_p12), %s3868_s21, 0 }
 0x5a4   : > { %2606 = sbr.rel (%p2747_p13) target bundleno = 1468 (0x5bc), region = 149  ;;  %s4048_s9 = smov (!%p2747_p13), %s3862_s19 }
 0x5a5   : > { %s4049_s23 = smov (!%p2747_p13), %s3223_s25  ;;  %s3877_s10 = smov (!%p2747_p13), 0  }
 0x5a6   : > { %s3879_s12 = smov (!%p2747_p13), 0  }
 0x5ab LB: >> { %v2415_v40 = vld [vmem:[%s3083_s23] sm:$0xff]  ;;  %v2417_v41 = vld [vmem:[%s3083_s23 + $0x8] sm:$0xff]  ;;  %v2419_v33 = vld [vmem:[%s3083_s23 + $0x10] sm:$0xff]  ;;  %s2479_s13 = sadd.s32 1, %s3087_s10  ;;  %s2409_s12 = sadd.s32 1, %s3091_s12   ;;  %s3091_s12 = sphi %s3879_s12, %s2409_s12   ;;  %s3087_s10 = sphi %s3877_s10, %s4052_s10   ;;  %s3083_s23 = sphi %s4049_s23, %s4051_s23   ;;  %s3079_s9 = sphi %s4048_s9, %s4050_s9  }
 0x5ac   : >> { %2416 = vst [vmem:[%s3079_s9] sm:$0xff] %v2415_v40  ;;  %2418 = vst [vmem:[%s3079_s9 + $0x8] sm:$0xff] %v2417_v41  ;;  %v2421_v37 = vld [vmem:[%s3083_s23 + $0x18] sm:$0xff]  ;;  %v2423_v42 = vld [vmem:[%s3083_s23 + $0x20] sm:$0xff]  ;;  %p2480_p0 = scmp.ge.s32.totalorder %s2479_s13, %s3868_s21  ;;  %p2408_p1 = scmp.ge.s32.totalorder %s2409_s12, %s3868_s21 }
 0x5ad   : >> { %2420 = vst [vmem:[%s3079_s9 + $0x10] sm:$0xff] %v2419_v33  ;;  %v2425_v43 = vld [vmem:[%s3083_s23 + $0x28] sm:$0xff]  ;;  %2422 = vst [vmem:[%s3079_s9 + $0x18] sm:$0xff] %v2421_v37  ;;  %v2427_v44 = vld [vmem:[%s3083_s23 + $0x30] sm:$0xff] }
 0x5ae   : >> { %2424 = vst [vmem:[%s3079_s9 + $0x20] sm:$0xff] %v2423_v42  ;;  %2426 = vst [vmem:[%s3079_s9 + $0x28] sm:$0xff] %v2425_v43  ;;  %v2429_v45 = vld [vmem:[%s3083_s23 + $0x38] sm:$0xff]  ;;  %v2431_v46 = vld [vmem:[%s3083_s23 + $0x40] sm:$0xff]  ;;  %s4061_s13 = smov (%p2480_p0, %s2479_s13), 0 }
 0x5af   : >> { %2428 = vst [vmem:[%s3079_s9 + $0x30] sm:$0xff] %v2427_v44  ;;  %2430 = vst [vmem:[%s3079_s9 + $0x38] sm:$0xff] %v2429_v45  ;;  %v2433_v47 = vld [vmem:[%s3083_s23 + $0x48] sm:$0xff]  ;;  %v2435_v48 = vld [vmem:[%s3083_s23 + $0x50] sm:$0xff]  ;;  %s2748_s20 = sshll.u32 %s4061_s13, 8 }
 0x5b0   : >> { %2432 = vst [vmem:[%s3079_s9 + $0x40] sm:$0xff] %v2431_v46  ;;  %v2437_v49 = vld [vmem:[%s3083_s23 + $0x58] sm:$0xff]  ;;  %2434 = vst [vmem:[%s3079_s9 + $0x48] sm:$0xff] %v2433_v47  ;;  %v2439_v0 = vld [vmem:[%s3083_s23 + $0x60] sm:$0xff]  ;;  %s3935_s10 = scalar_lea.vmem %s3223_s25, %s2748_s20 [#allocation2]   ;;  %s2485_s24 = scalar_lea.vmem %s3862_s19, %s2748_s20  }
 0x5b1   : >> { %2436 = vst [vmem:[%s3079_s9 + $0x50] sm:$0xff] %v2435_v48  ;;  %2438 = vst [vmem:[%s3079_s9 + $0x58] sm:$0xff] %v2437_v49  ;;  %v2441_v50 = vld [vmem:[%s3083_s23 + $0x68] sm:$0xff]  ;;  %v2443_v51 = vld [vmem:[%s3083_s23 + $0x70] sm:$0xff] }
 0x5b2   : >> { %2440 = vst [vmem:[%s3079_s9 + $0x60] sm:$0xff] %v2439_v0  ;;  %2442 = vst [vmem:[%s3079_s9 + $0x68] sm:$0xff] %v2441_v50  ;;  %v2445_v52 = vld [vmem:[%s3083_s23 + $0x78] sm:$0xff]  ;;  %v2447_v53 = vld [vmem:[%s3083_s23 + $0x80] sm:$0xff] }
 0x5b3   : >> { %2444 = vst [vmem:[%s3079_s9 + $0x70] sm:$0xff] %v2443_v51  ;;  %v2449_v54 = vld [vmem:[%s3083_s23 + $0x88] sm:$0xff]  ;;  %2446 = vst [vmem:[%s3079_s9 + $0x78] sm:$0xff] %v2445_v52  ;;  %v2451_v63 = vld [vmem:[%s3083_s23 + $0x90] sm:$0xff] }
 0x5b4   : >> { %2448 = vst [vmem:[%s3079_s9 + $0x80] sm:$0xff] %v2447_v53  ;;  %2450 = vst [vmem:[%s3079_s9 + $0x88] sm:$0xff] %v2449_v54  ;;  %v2453_v55 = vld [vmem:[%s3083_s23 + $0x98] sm:$0xff]  ;;  %v2455_v56 = vld [vmem:[%s3083_s23 + $0xa0] sm:$0xff] }
 0x5b5   : >> { %2452 = vst [vmem:[%s3079_s9 + $0x90] sm:$0xff] %v2451_v63  ;;  %2454 = vst [vmem:[%s3079_s9 + $0x98] sm:$0xff] %v2453_v55  ;;  %v2457_v57 = vld [vmem:[%s3083_s23 + $0xa8] sm:$0xff]  ;;  %v2459_v58 = vld [vmem:[%s3083_s23 + $0xb0] sm:$0xff]  ;;  %2411 = sbr.rel (!%p2408_p1) target bundleno = 1451 (0x5ab), region = 155 }
 0x5b6   : >> { %2456 = vst [vmem:[%s3079_s9 + $0xa0] sm:$0xff] %v2455_v56  ;;  %v2461_v59 = vld [vmem:[%s3083_s23 + $0xb8] sm:$0xff]  ;;  %2458 = vst [vmem:[%s3079_s9 + $0xa8] sm:$0xff] %v2457_v57  ;;  %v2463_v60 = vld [vmem:[%s3083_s23 + $0xc0] sm:$0xff] }
 0x5b7   : >> { %2460 = vst [vmem:[%s3079_s9 + $0xb0] sm:$0xff] %v2459_v58  ;;  %2462 = vst [vmem:[%s3079_s9 + $0xb8] sm:$0xff] %v2461_v59  ;;  %v2465_v61 = vld [vmem:[%s3083_s23 + $0xc8] sm:$0xff]  ;;  %v2467_v62 = vld [vmem:[%s3083_s23 + $0xd0] sm:$0xff] }
 0x5b8   : >> { %2464 = vst [vmem:[%s3079_s9 + $0xc0] sm:$0xff] %v2463_v60  ;;  %2466 = vst [vmem:[%s3079_s9 + $0xc8] sm:$0xff] %v2465_v61  ;;  %v2469_v1 = vld [vmem:[%s3083_s23 + $0xd8] sm:$0xff]  ;;  %v2471_v2 = vld [vmem:[%s3083_s23 + $0xe0] sm:$0xff] }
 0x5b9   : >> { %2468 = vst [vmem:[%s3079_s9 + $0xd0] sm:$0xff] %v2467_v62  ;;  %v2473_v3 = vld [vmem:[%s3083_s23 + $0xe8] sm:$0xff]  ;;  %2470 = vst [vmem:[%s3079_s9 + $0xd8] sm:$0xff] %v2469_v1  ;;  %v2475_v4 = vld [vmem:[%s3083_s23 + $0xf0] sm:$0xff] }
 0x5ba   : >> { %2472 = vst [vmem:[%s3079_s9 + $0xe0] sm:$0xff] %v2471_v2  ;;  %2474 = vst [vmem:[%s3079_s9 + $0xe8] sm:$0xff] %v2473_v3  ;;  %v2477_v5 = vld [vmem:[%s3083_s23 + $0xf8] sm:$0xff]  ;;  %s4051_s23 = smov %s3935_s10  ;;  %s4052_s10 = smov %s4061_s13 }
 0x5bb   : >> { %2476 = vst [vmem:[%s3079_s9 + $0xf0] sm:$0xff] %v2475_v4  ;;  %2478 = vst [vmem:[%s3079_s9 + $0xf8] sm:$0xff] %v2477_v5  ;;  %s4050_s9 = smov %s2485_s24 }
 0x5bc PF: > { %s3976_s20 = sand.u32 31, %s4059_s26   ;;  %s2761_s0 = sshll.u32 %s3868_s21, 8 }
 0x5bd   : > { %s2490_s1 = scalar_lea.vmem %s3223_s25, %s2761_s0 [#allocation2]   ;;  %s2492_s2 = scalar_lea.vmem %s3862_s19, %s2761_s0  }
 0x5be   : > { %p2753_p2 = scmp.le.s32.totalorder %s3976_s20, 0 }
 0x5bf   : > { %s3093_s24 = smov (!%p2753_p2), %s2492_s2   ;;  %s3097_s3 = smov (!%p2753_p2), %s2490_s1  }
 0x5c0   : > { %2620 = sbr.rel (%p2753_p2) target bundleno = 1489 (0x5d1), region = 160  ;;  %s3101_s4 = smov (!%p2753_p2), 0  }
 0x5c1   : > { %s3105_s13 = smov (!%p2753_p2), 0  }
 0x5c7 LB: >> { %v2502_v6 = vld [vmem:[%s3099_s3] sm:$0xff]  ;;  %s2504_s26 = sadd.s32 1, %s3103_s4  ;;  %s2496_s13 = sadd.s32 1, %s3107_s13   ;;  %s3107_s13 = sphi %s3105_s13, %s2496_s13   ;;  %s3103_s4 = sphi %s3101_s4, %s3102_s4   ;;  %s3099_s3 = sphi %s3097_s3, %s2509_s3   ;;  %s3095_s24 = sphi %s3093_s24, %s2510_s24  }
 0x5c8   : >> { %2503 = vst [vmem:[%s3095_s24] sm:$0xff] %v2502_v6  ;;  %p2505_p3 = scmp.ge.s32.totalorder %s2504_s26, %s3976_s20  ;;  %p2495_p4 = scmp.ge.s32.totalorder %s2496_s13, %s3976_s20 }
 0x5ca   : >> { %s4063_s26 = smov (%p2505_p3, %s2504_s26), 0  ;;  %2498 = sbr.rel (!%p2495_p4) target bundleno = 1479 (0x5c7), region = 166 }
 0x5cb   : >> { %s2754_s0 = sshll.u32 %s4063_s26, 3  ;;  %s3102_s4 = smov %s4063_s26  }
 0x5cc   : >> { %s2509_s3 = scalar_lea.vmem %s2490_s1, %s2754_s0 [#allocation2]   ;;  %s2510_s24 = scalar_lea.vmem %s2492_s2, %s2754_s0  }
 0x5d1 PF: > { %s3988_s19 = scalar_lea.hbm %s4035_s8, %s3207_s17  ;;  %s2524_s21 = sshll.u32 %s3755_s22, 4  ;;  %s2525_s21 = int_to_ptr.vmem [resolvable:$true] %s2524_s21 }
 0x5d2   : > { %s2981_s9 = scalar_lea.vmem %s2525_s21, 32  ;;  %s3112_s3 = smov [#allocation3]  }
 0x5d3   : > { %p2982_p7 = scmp.ne.s32.totalorder %s2525_s21, %s2981_s9  ;;  %s2985_s23 = sshll.u32 %s3112_s3, 4  ;;  %s2986_s23 = int_to_ptr.vmem [resolvable:$false] %s2985_s23 }
 0x5d4   : > { %s2987_s1 = scalar_lea.vmem %s2986_s23, 64  ;;  %p2988_p10 = scmp.lt.s32.totalorder %s2525_s21, %s2986_s23 }
 0x5d5   : > { %p2983_p8 = pnand %p2982_p7, %p3196_p5  ;;  %p2989_p11 = scmp.lt.s32.totalorder %s2987_s1, %s2981_s9 }
 0x5d7   : > { %p2984_p9 = pneg %p2983_p8  ;;  %p2990_p12 = por %p2989_p11, %p2988_p10 }
 0x5d9   : > { %p2991_p13 = pnand %p2990_p12, %p2984_p9 }
 0x5db   : > { %2994 = shalt.err (!%p2991_p13)
}
 0x5dc   : > { %s2995_s2 = scalar_lea.hbm %s3988_s19, 32  ;;  %s2999_s12 = scalar_lea.hbm %s4035_s8, 64 }
 0x5dd   : > { %p2996_p0 = scmp.ne.s32.totalorder %s3988_s19, %s2995_s2  ;;  %p3000_p3 = scmp.lt.u32.totalorder %s3988_s19, %s4035_s8 }
 0x5de   : > { %p3001_p4 = scmp.lt.u32.totalorder %s2999_s12, %s2995_s2  ;;  %p3003_p8 = scmp.lt.u32.totalorder %s2995_s2, %s3988_s19 }
 0x5df   : > { %p2997_p1 = pnand %p2996_p0, %p3196_p5 }
 0x5e0   : > { %p3002_p7 = por %p3001_p4, %p3000_p3 }
 0x5e1   : > { %p2998_p2 = pneg %p2997_p1 }
 0x5e2   : > { %p3004_p9 = por %p3003_p8, %p3002_p7 }
 0x5e4   : > { %p3005_p10 = pnand %p3004_p9, %p2998_p2 }
 0x5e6   : > { %3008 = shalt.err (!%p3005_p10)
}
 0x5e7   : > { %s4053_s24 = scalar_lea.sflag [#allocation4], %s3210_s18 }
 0x5e8   : > { %2764 = dma.vmem_to_hbm [thread:$0]  (%p3196_p5), %s2525_s21, 32, %s3988_s19, %s4053_s24  }
 0x5e9 PF: > { %p2770_p11 = scmp.ge.s32.totalorder %s3075_s30, 2  ;;  %s2543_s13 = sand.u32 1, %s3063_s27  }
 0x5ea   : > { %s2544_s26 = scalar_lea.sflag [#allocation4], %s2543_s13 }
 0x5eb   : > { %p2767_p12 = pnand %p2770_p11, %p3200_p6 }
 0x5ed   : > { %3058 = dma.done.wait (!%p2767_p12), %s2544_s26, 32  }
 0x5ee   : > { %3060 = vsyncadd (!%p2767_p12), %s2544_s26, 4294967264  ;;  %p19_p13 = scmp.ge.s32.totalorder %s3183_s11, 4   ;;  %s4054_s27 = smov %s3067_s28 }
 0x5ef   : > { %s4055_s28 = smov %s3071_s29  ;;  %s4056_s29 = smov %s3194_s14 }
 0x5f0   : > { %s4057_s30 = smov %s3183_s11  ;;  %21 = sbr.rel (!%p19_p13) target bundleno = 9 (0x9), region = 177 }
 0x5f7   :  { %2549 = vsyncpa [#allocation4], 1 }
 0x5f8   :  { %2551 = vsyncpa [#allocation4 + $0x1], 1 }

</bundles_post_ra>
